<compile_context>
chip_gen: v7x
topology: tpu7x:2x2x1
jax: 0.10.0
libtpu: 0.0.40
codegen_flags: <defaults>
</compile_context>

<pallas_src>
import functools
import math

import jax
import jax.numpy as jnp
import numpy as np
from jax.experimental import pallas as pl
from jax.experimental.pallas import tpu as pltpu

# --------------------------------------------------------------------------
# Small synthetic RPN config (consistent with the module's asserts)
# --------------------------------------------------------------------------
LAYER_NUMS = [1, 1]
DS_LAYER_STRIDES = [1, 2]
DS_NUM_FILTERS = [8, 16]
US_LAYER_STRIDES = [1, 2]
US_NUM_FILTERS = [8, 8]
NUM_INPUT_FEATURES = 4
BN_EPS = 1e-3  # norm_cfg eps=0.001
UPSAMPLE_START_IDX = len(LAYER_NUMS) - len(US_LAYER_STRIDES)


# --------------------------------------------------------------------------
# Pallas kernels
# --------------------------------------------------------------------------
def _matmul_bias_relu_kernel(x_ref, w_ref, b_ref, o_ref):
    """o = relu(w @ x + b) for one (batch, pixel-tile) grid cell.
       x_ref: (1, K, TP) bf16   w_ref: (Co, K) bf16
       b_ref: (Co, 1)  f32      o_ref: (1, Co, TP) bf16  (pixels on lanes)
    """
    acc = jnp.dot(w_ref[...], x_ref[0], preferred_element_type=jnp.float32)
    o_ref[0] = jnp.maximum(acc + b_ref[...], 0.0).astype(o_ref.dtype)


def _conv3x3_s1_kernel(xf_ref, w_ref, b_ref, o_ref, taps_ref, *, wp, length):
    """3x3 / stride-1 / pad-1 conv + bias + ReLU on a flat zero-padded image.
       xf_ref : (1, Cin, Hp*Wp) bf16  -- zero-padded NCHW image, H,W flattened
       w_ref  : (Cout, 9*Cin)   bf16  -- BN scale already folded in
       b_ref  : (Cout, 1)       f32
       o_ref  : (1, Cout, length) bf16, length = H*Wp - 2 (valid output pixel
                (h, w) sits at flat index h*Wp + w; caller discards the rest)
       taps_ref: (9*Cin, length) bf16 VMEM scratch.
    Tap (ky, kx) of output flat-pixel q is xf[:, q + ky*Wp + kx], so each tap
    is a contiguous lane slice of the flat padded image.  The 9 slices are
    stacked on the sublane axis and contracted with ONE MXU matmul (K = 9*Cin)
    -- no im2col tensor ever touches HBM.
    """
    cin = xf_ref.shape[1]
    for t in range(9):  # static unroll
        ky, kx = t // 3, t % 3
        off = ky * wp + kx
        taps_ref[t * cin:(t + 1) * cin, :] = xf_ref[0, :, off:off + length]
    acc = jnp.dot(w_ref[...], taps_ref[...], preferred_element_type=jnp.float32)
    o_ref[0] = jnp.maximum(acc + b_ref[...], 0.0).astype(o_ref.dtype)


# --------------------------------------------------------------------------
# pallas_call wrappers
# --------------------------------------------------------------------------
def _pick_pixel_tile(p, max_tp=2048):
    """Largest tile <= max_tp that divides P and is a multiple of 128, else P."""
    if p % 128 == 0:
        tp = min(p, max_tp)
        while p % tp:
            tp -= 128
        return tp
    return p


def matmul_bias_relu(x, w_mat, b):
    """x: (N, K, P) bf16, w_mat: (Co, K) bf16, b: (Co,) f32 -> (N, Co, P) bf16."""
    n, k, p = x.shape
    co = w_mat.shape[0]
    tp = _pick_pixel_tile(p)
    return pl.pallas_call(
        _matmul_bias_relu_kernel,
        out_shape=jax.ShapeDtypeStruct((n, co, p), jnp.bfloat16),
        grid=(n, p // tp),
        in_specs=[
            pl.BlockSpec((1, k, tp), lambda i, j: (i, 0, j)),
            pl.BlockSpec((co, k), lambda i, j: (0, 0)),
            pl.BlockSpec((co, 1), lambda i, j: (0, 0)),
        ],
        out_specs=pl.BlockSpec((1, co, tp), lambda i, j: (i, 0, j)),
        compiler_params=pltpu.CompilerParams(
            dimension_semantics=("parallel", "parallel")),
    )(x, w_mat, b.reshape(co, 1))


def conv3x3_s1(x, w_mat, b):
    """3x3/stride-1/pad-1 conv + bias + ReLU.  x: (N, Cin, H, W) bf16, Cin % 8 == 0."""
    n, cin, h, w = x.shape
    hp, wp = h + 2, w + 2
    length = h * wp - 2                       # pixels computed on the padded grid
    cout = w_mat.shape[0]
    xf = jnp.pad(x, ((0, 0), (0, 0), (1, 1), (1, 1))).reshape(n, cin, hp * wp)
    # TODO(synk): tile the pixel axis (with a 1-row halo) and fuse consecutive
    # stride-1 convs of a block into one pallas_call keeping intermediates in VMEM.
    yb = pl.pallas_call(
        functools.partial(_conv3x3_s1_kernel, wp=wp, length=length),
        out_shape=jax.ShapeDtypeStruct((n, cout, length), jnp.bfloat16),
        grid=(n,),
        in_specs=[
            pl.BlockSpec((1, cin, hp * wp), lambda i: (i, 0, 0)),
            pl.BlockSpec((cout, 9 * cin), lambda i: (0, 0)),
            pl.BlockSpec((cout, 1), lambda i: (0, 0)),
        ],
        out_specs=pl.BlockSpec((1, cout, length), lambda i: (i, 0, 0)),
        scratch_shapes=[pltpu.VMEM((9 * cin, length), jnp.bfloat16)],
        compiler_params=pltpu.CompilerParams(dimension_semantics=("parallel",)),
    )(xf, w_mat, b.reshape(cout, 1))
    # Valid output pixel (h, w) lives at flat index h*Wp + w -> drop pad columns.
    yb = jnp.pad(yb, ((0, 0), (0, 0), (0, h * wp - length)))
    return yb.reshape(n, cout, h, wp)[:, :, :, :w]


# --------------------------------------------------------------------------
# Plain-JAX glue
# --------------------------------------------------------------------------
def _im2col_strided(x, stride):
    """Strided 3x3 taps (only used for the stride>1 first conv of a block).
       x: (N, Cin, H, W) -> (N, 9*Cin, Ho*Wo), row order t*Cin + ci, t = ky*3+kx."""
    n, cin, h, w = x.shape
    xp = jnp.pad(x, ((0, 0), (0, 0), (1, 1), (1, 1)))
    ho = (h + 2 - 3) // stride + 1
    wo = (w + 2 - 3) // stride + 1
    taps = []
    for ky in range(3):
        for kx in range(3):
            taps.append(xp[:, :, ky:ky + stride * (ho - 1) + 1:stride,
                               kx:kx + stride * (wo - 1) + 1:stride]
                        .reshape(n, cin, ho * wo))
    # TODO(synk): generate strided taps inside the kernel too (lane-strided
    # slices) to avoid this 9x materialization for stride>1 layers.
    return jnp.concatenate(taps, axis=1), ho, wo


def _conv_w_mat(wq, cin_pad=None):
    """(T, Cin, Cout) folded bf16 weight -> (Cout, T*Cin[_pad]) matmul LHS."""
    t, cin, cout = wq.shape
    if cin_pad is not None and cin_pad > cin:
        wq = jnp.pad(wq, ((0, 0), (0, cin_pad - cin), (0, 0)))
    return jnp.transpose(wq, (2, 0, 1)).reshape(cout, -1)


def _deconv_w_mat(wq):
    """(4, Cin, Cout) folded bf16 weight -> (4*Cout, Cin), rows ordered (t, co)."""
    t, cin, cout = wq.shape
    return jnp.transpose(wq, (0, 2, 1)).reshape(4 * cout, cin)


# --------------------------------------------------------------------------
# Deterministic parameter init (shapes per RPN.__init__; BN folded, scale in w)
# --------------------------------------------------------------------------
def _folded_bn(key, c):
    """Eval-mode BatchNorm folded to (scale, bias)."""
    k1, k2, k3, k4 = jax.random.split(key, 4)
    gamma = jax.random.uniform(k1, (c,), jnp.float32, 0.5, 1.5)
    beta = 0.1 * jax.random.normal(k2, (c,), jnp.float32)
    mean = 0.1 * jax.random.normal(k3, (c,), jnp.float32)
    var = jax.random.uniform(k4, (c,), jnp.float32, 0.5, 1.5)
    scale = gamma / jnp.sqrt(var + BN_EPS)
    return scale, beta - mean * scale


def _conv_w(key, taps, cin, cout):
    # weight[t, ci, co] corresponds to torch weight[co, ci, ky, kx], t = ky*K + kx
    return (jax.random.normal(key, (taps, cin, cout), jnp.float32)
            / math.sqrt(taps * cin))


def init_params(key):
    """Conv weights with the eval-mode BN scale folded in (bf16), bias kept f32."""
    blocks, deblocks = [], []
    in_filters = [NUM_INPUT_FEATURES, *DS_NUM_FILTERS[:-1]]
    for i, layer_num in enumerate(LAYER_NUMS):
        layers = []
        cin, cout = in_filters[i], DS_NUM_FILTERS[i]
        key, kw, kb = jax.random.split(key, 3)
        s, b = _folded_bn(kb, cout)
        layers.append(dict(wq=(_conv_w(kw, 9, cin, cout) * s).astype(jnp.bfloat16),
                           b=b, stride=DS_LAYER_STRIDES[i]))
        for _ in range(layer_num):
            key, kw, kb = jax.random.split(key, 3)
            s, b = _folded_bn(kb, cout)
            layers.append(dict(wq=(_conv_w(kw, 9, cout, cout) * s).astype(jnp.bfloat16),
                               b=b, stride=1))
        blocks.append(layers)
        if i - UPSAMPLE_START_IDX >= 0:
            j = i - UPSAMPLE_START_IDX
            us, uc = US_LAYER_STRIDES[j], US_NUM_FILTERS[j]
            key, kw, kb = jax.random.split(key, 3)
            s, b = _folded_bn(kb, uc)
            if us > 1:      # ConvTranspose2d(cout, uc, us, stride=us); here us == 2
                deblocks.append(dict(kind="deconv2x2",
                                     wq=(_conv_w(kw, 4, cout, uc) * s).astype(jnp.bfloat16),
                                     b=b))
            else:           # Conv2d(cout, uc, 1, stride=1)
                deblocks.append(dict(kind="conv1x1",
                                     wq=(_conv_w(kw, 1, cout, uc) * s).astype(jnp.bfloat16),
                                     b=b))
    return dict(blocks=blocks, deblocks=deblocks)


# --------------------------------------------------------------------------
# RPN forward (Pallas) and a pure-XLA reference for validation
# --------------------------------------------------------------------------
def rpn_forward_pallas(x_nchw, params):
    x = x_nchw.astype(jnp.bfloat16)                     # NCHW throughout
    ups = []
    for i, layers in enumerate(params["blocks"]):
        # x = F.relu(blocks[i](x)): a ReLU follows every conv+BN overall.
        for layer in layers:
            n, cin, h, w = x.shape
            cout = layer["wq"].shape[2]
            if layer["stride"] == 1:
                cin_pad = -(-cin // 8) * 8              # sublane-align channels
                xin = x if cin_pad == cin else jnp.pad(
                    x, ((0, 0), (0, cin_pad - cin), (0, 0), (0, 0)))
                x = conv3x3_s1(xin, _conv_w_mat(layer["wq"], cin_pad), layer["b"])
            else:
                taps, ho, wo = _im2col_strided(x, layer["stride"])
                x = matmul_bias_relu(taps, _conv_w_mat(layer["wq"]),
                                     layer["b"]).reshape(n, cout, ho, wo)
        if i - UPSAMPLE_START_IDX >= 0:
            db = params["deblocks"][i - UPSAMPLE_START_IDX]
            n, c, h, w = x.shape
            cout = db["wq"].shape[2]
            xf = x.reshape(n, c, h * w)
            if db["kind"] == "conv1x1":
                y = matmul_bias_relu(xf, _conv_w_mat(db["wq"]), db["b"])
                ups.append(y.reshape(n, cout, h, w))
            else:
                # ConvTranspose2d(k=2, s=2): kernel == stride -> 4 disjoint taps,
                # computed as one (4*Cout, Cin) @ (Cin, P) matmul.
                y = matmul_bias_relu(xf, _deconv_w_mat(db["wq"]),
                                     jnp.tile(db["b"], 4))
                y = (y.reshape(n, 2, 2, cout, h, w)     # (ky, kx, co, h, w)
                       .transpose(0, 3, 4, 1, 5, 2)     # (co, h, ky, w, kx)
                       .reshape(n, cout, 2 * h, 2 * w))
                # TODO(synk): write the 2x2 interleave straight from the kernel via a
                # strided output index_map to skip this XLA transpose copy.
                ups.append(y)
    return jnp.concatenate(ups, axis=1).astype(jnp.float32)   # torch.cat(ups, dim=1)


def rpn_forward_ref(x_nchw, params):
    """Pure-XLA reference (lax.conv, NCHW).  Uses the same bf16-quantized folded
    weights / bf16 activations as the Pallas path, so only the f32 accumulation
    order differs."""
    dn = ("NCHW", "HWIO", "NCHW")
    hi = jax.lax.Precision.HIGHEST

    def q(a):  # bf16 round-trip to mirror the kernel's bf16 activations
        return a.astype(jnp.bfloat16).astype(jnp.float32)

    x = q(x_nchw.astype(jnp.float32))
    ups = []
    for i, layers in enumerate(params["blocks"]):
        for layer in layers:
            _, cin, cout = layer["wq"].shape
            wk = layer["wq"].astype(jnp.float32).reshape(3, 3, cin, cout)
            s = layer["stride"]
            y = jax.lax.conv_general_dilated(
                x, wk, (s, s), ((1, 1), (1, 1)),
                dimension_numbers=dn, precision=hi)
            x = q(jnp.maximum(y + layer["b"][None, :, None, None], 0.0))
        if i - UPSAMPLE_START_IDX >= 0:
            db = params["deblocks"][i - UPSAMPLE_START_IDX]
            _, cin, cout = db["wq"].shape
            wf = db["wq"].astype(jnp.float32)
            if db["kind"] == "conv1x1":
                y = jax.lax.conv_general_dilated(
                    x, wf.reshape(1, 1, cin, cout), (1, 1), ((0, 0), (0, 0)),
                    dimension_numbers=dn, precision=hi)
            else:  # ConvTranspose2d(k=2, s=2) == lhs-dilated conv with flipped kernel
                y = jax.lax.conv_general_dilated(
                    x, wf.reshape(2, 2, cin, cout)[::-1, ::-1], (1, 1),
                    ((1, 1), (1, 1)), lhs_dilation=(2, 2),
                    dimension_numbers=dn, precision=hi)
            ups.append(q(jnp.maximum(y + db["b"][None, :, None, None], 0.0)))
    return jnp.concatenate(ups, axis=1)


# --------------------------------------------------------------------------
if __name__ == "__main__":
    key = jax.random.PRNGKey(0)
    kp, kx = jax.random.split(key)
    params = init_params(kp)
    x = jax.random.normal(kx, (2, NUM_INPUT_FEATURES, 16, 16), jnp.float32)

    fwd = jax.jit(lambda inp: rpn_forward_pallas(inp, params))
    out = fwd(x)
    jax.block_until_ready(out)

    ref = rpn_forward_ref(x, params)
    assert out.shape == (2, sum(US_NUM_FILTERS), 16, 16), out.shape
    np.testing.assert_allclose(np.asarray(out), np.asarray(ref),
                               rtol=2e-2, atol=2e-2)
    print("KERNEL_OK")
</pallas_src>

<mosaic_0001>
module attributes {stable_mosaic.version = 11 : i64} {
  func.func @_conv3x3_s1_kernel(%arg0: i32, %arg1: memref<1x8x324xbf16, #tpu.memory_space<vmem>>, %arg2: memref<8x72xbf16, #tpu.memory_space<vmem>>, %arg3: memref<8x1xf32, #tpu.memory_space<vmem>>, %arg4: memref<1x8x286xbf16, #tpu.memory_space<vmem>>, %arg5: memref<72x286xbf16, #tpu.memory_space<vmem>>) attributes {dimension_semantics = [#tpu.dimension_semantics<parallel>], iteration_bounds = array<i64: 2>, scalar_prefetch = 0 : i64, scratch_operands = 1 : i64, tpu.core_type = #tpu.core_type<tc>, window_params = [{transform_indices = @transform_0, window_bounds = array<i64: 1, 8, 324>}, {pipeline_mode = #tpu.pipeline_mode<synchronous>, transform_indices = @transform_1, window_bounds = array<i64: 8, 72>}, {pipeline_mode = #tpu.pipeline_mode<synchronous>, transform_indices = @transform_2, window_bounds = array<i64: 8, 1>}, {transform_indices = @transform_3, window_bounds = array<i64: 1, 8, 286>}]} {
    %c0 = arith.constant 0 : index
    %c0_0 = arith.constant 0 : index
    %c0_1 = arith.constant 0 : index
    %0 = vector.load %arg1[%c0, %c0_0, %c0_1] : memref<1x8x324xbf16, #tpu.memory_space<vmem>>, vector<1x8x286xbf16>
    %1 = vector.shape_cast %0 : vector<1x8x286xbf16> to vector<8x286xbf16>
    %c0_2 = arith.constant 0 : index
    %c0_3 = arith.constant 0 : index
    %2 = vector.load %arg5[%c0_2, %c0_3] : memref<72x286xbf16, #tpu.memory_space<vmem>>, vector<8x286xbf16>
    tpu.vector_store %arg5[%c0_2, %c0_3], %1 {strides = array<i32>} : memref<72x286xbf16, #tpu.memory_space<vmem>>, vector<8x286xbf16>,
    %c0_4 = arith.constant 0 : index
    %c0_5 = arith.constant 0 : index
    %c1 = arith.constant 1 : index
    %3 = vector.load %arg1[%c0_4, %c0_5, %c1] : memref<1x8x324xbf16, #tpu.memory_space<vmem>>, vector<1x8x286xbf16>
    %4 = vector.shape_cast %3 : vector<1x8x286xbf16> to vector<8x286xbf16>
    %c8 = arith.constant 8 : index
    %c0_6 = arith.constant 0 : index
    %5 = vector.load %arg5[%c8, %c0_6] : memref<72x286xbf16, #tpu.memory_space<vmem>>, vector<8x286xbf16>
    tpu.vector_store %arg5[%c8, %c0_6], %4 {strides = array<i32>} : memref<72x286xbf16, #tpu.memory_space<vmem>>, vector<8x286xbf16>,
    %c0_7 = arith.constant 0 : index
    %c0_8 = arith.constant 0 : index
    %c2 = arith.constant 2 : index
    %6 = vector.load %arg1[%c0_7, %c0_8, %c2] : memref<1x8x324xbf16, #tpu.memory_space<vmem>>, vector<1x8x286xbf16>
    %7 = vector.shape_cast %6 : vector<1x8x286xbf16> to vector<8x286xbf16>
    %c16 = arith.constant 16 : index
    %c0_9 = arith.constant 0 : index
    %8 = vector.load %arg5[%c16, %c0_9] : memref<72x286xbf16, #tpu.memory_space<vmem>>, vector<8x286xbf16>
    tpu.vector_store %arg5[%c16, %c0_9], %7 {strides = array<i32>} : memref<72x286xbf16, #tpu.memory_space<vmem>>, vector<8x286xbf16>,
    %c0_10 = arith.constant 0 : index
    %c0_11 = arith.constant 0 : index
    %c18 = arith.constant 18 : index
    %9 = vector.load %arg1[%c0_10, %c0_11, %c18] : memref<1x8x324xbf16, #tpu.memory_space<vmem>>, vector<1x8x286xbf16>
    %10 = vector.shape_cast %9 : vector<1x8x286xbf16> to vector<8x286xbf16>
    %c24 = arith.constant 24 : index
    %c0_12 = arith.constant 0 : index
    %11 = vector.load %arg5[%c24, %c0_12] : memref<72x286xbf16, #tpu.memory_space<vmem>>, vector<8x286xbf16>
    tpu.vector_store %arg5[%c24, %c0_12], %10 {strides = array<i32>} : memref<72x286xbf16, #tpu.memory_space<vmem>>, vector<8x286xbf16>,
    %c0_13 = arith.constant 0 : index
    %c0_14 = arith.constant 0 : index
    %c19 = arith.constant 19 : index
    %12 = vector.load %arg1[%c0_13, %c0_14, %c19] : memref<1x8x324xbf16, #tpu.memory_space<vmem>>, vector<1x8x286xbf16>
    %13 = vector.shape_cast %12 : vector<1x8x286xbf16> to vector<8x286xbf16>
    %c32 = arith.constant 32 : index
    %c0_15 = arith.constant 0 : index
    %14 = vector.load %arg5[%c32, %c0_15] : memref<72x286xbf16, #tpu.memory_space<vmem>>, vector<8x286xbf16>
    tpu.vector_store %arg5[%c32, %c0_15], %13 {strides = array<i32>} : memref<72x286xbf16, #tpu.memory_space<vmem>>, vector<8x286xbf16>,
    %c0_16 = arith.constant 0 : index
    %c0_17 = arith.constant 0 : index
    %c20 = arith.constant 20 : index
    %15 = vector.load %arg1[%c0_16, %c0_17, %c20] : memref<1x8x324xbf16, #tpu.memory_space<vmem>>, vector<1x8x286xbf16>
    %16 = vector.shape_cast %15 : vector<1x8x286xbf16> to vector<8x286xbf16>
    %c40 = arith.constant 40 : index
    %c0_18 = arith.constant 0 : index
    %17 = vector.load %arg5[%c40, %c0_18] : memref<72x286xbf16, #tpu.memory_space<vmem>>, vector<8x286xbf16>
    tpu.vector_store %arg5[%c40, %c0_18], %16 {strides = array<i32>} : memref<72x286xbf16, #tpu.memory_space<vmem>>, vector<8x286xbf16>,
    %c0_19 = arith.constant 0 : index
    %c0_20 = arith.constant 0 : index
    %c36 = arith.constant 36 : index
    %18 = vector.load %arg1[%c0_19, %c0_20, %c36] : memref<1x8x324xbf16, #tpu.memory_space<vmem>>, vector<1x8x286xbf16>
    %19 = vector.shape_cast %18 : vector<1x8x286xbf16> to vector<8x286xbf16>
    %c48 = arith.constant 48 : index
    %c0_21 = arith.constant 0 : index
    %20 = vector.load %arg5[%c48, %c0_21] : memref<72x286xbf16, #tpu.memory_space<vmem>>, vector<8x286xbf16>
    tpu.vector_store %arg5[%c48, %c0_21], %19 {strides = array<i32>} : memref<72x286xbf16, #tpu.memory_space<vmem>>, vector<8x286xbf16>,
    %c0_22 = arith.constant 0 : index
    %c0_23 = arith.constant 0 : index
    %c37 = arith.constant 37 : index
    %21 = vector.load %arg1[%c0_22, %c0_23, %c37] : memref<1x8x324xbf16, #tpu.memory_space<vmem>>, vector<1x8x286xbf16>
    %22 = vector.shape_cast %21 : vector<1x8x286xbf16> to vector<8x286xbf16>
    %c56 = arith.constant 56 : index
    %c0_24 = arith.constant 0 : index
    %23 = vector.load %arg5[%c56, %c0_24] : memref<72x286xbf16, #tpu.memory_space<vmem>>, vector<8x286xbf16>
    tpu.vector_store %arg5[%c56, %c0_24], %22 {strides = array<i32>} : memref<72x286xbf16, #tpu.memory_space<vmem>>, vector<8x286xbf16>,
    %c0_25 = arith.constant 0 : index
    %c0_26 = arith.constant 0 : index
    %c38 = arith.constant 38 : index
    %24 = vector.load %arg1[%c0_25, %c0_26, %c38] : memref<1x8x324xbf16, #tpu.memory_space<vmem>>, vector<1x8x286xbf16>
    %25 = vector.shape_cast %24 : vector<1x8x286xbf16> to vector<8x286xbf16>
    %c64 = arith.constant 64 : index
    %c0_27 = arith.constant 0 : index
    %26 = vector.load %arg5[%c64, %c0_27] : memref<72x286xbf16, #tpu.memory_space<vmem>>, vector<8x286xbf16>
    tpu.vector_store %arg5[%c64, %c0_27], %25 {strides = array<i32>} : memref<72x286xbf16, #tpu.memory_space<vmem>>, vector<8x286xbf16>,
    %c0_28 = arith.constant 0 : index
    %c0_29 = arith.constant 0 : index
    %27 = vector.load %arg2[%c0_28, %c0_29] : memref<8x72xbf16, #tpu.memory_space<vmem>>, vector<8x72xbf16>
    %c0_30 = arith.constant 0 : index
    %c0_31 = arith.constant 0 : index
    %28 = vector.load %arg5[%c0_30, %c0_31] : memref<72x286xbf16, #tpu.memory_space<vmem>>, vector<72x286xbf16>
    %cst = arith.constant dense<0.000000e+00> : vector<8x286xf32>
    %29 = tpu.matmul %27, %28, %cst {dimension_numbers = #tpu.dot_dimension_numbers<[1], [0], [0], [1], [0, 0, 1, 1], [], []>} : vector<8x72xbf16>, vector<72x286xbf16>, vector<8x286xf32> -> vector<8x286xf32>
    %c0_32 = arith.constant 0 : index
    %c0_33 = arith.constant 0 : index
    %30 = vector.load %arg3[%c0_32, %c0_33] : memref<8x1xf32, #tpu.memory_space<vmem>>, vector<8x1xf32>
    %31 = vector.broadcast %30 : vector<8x1xf32> to vector<8x286xf32>
    %32 = arith.addf %29, %31 : vector<8x286xf32>
    %cst_34 = arith.constant 0.000000e+00 : f32
    %33 = vector.broadcast %cst_34 : f32 to vector<8x286xf32>
    %34 = arith.maximumf %32, %33 : vector<8x286xf32>
    %35 = arith.truncf %34 : vector<8x286xf32> to vector<8x286xbf16>
    %c0_35 = arith.constant 0 : index
    %c0_36 = arith.constant 0 : index
    %c0_37 = arith.constant 0 : index
    %36 = vector.load %arg4[%c0_35, %c0_36, %c0_37] : memref<1x8x286xbf16, #tpu.memory_space<vmem>>, vector<1x8x286xbf16>
    %37 = vector.shape_cast %36 : vector<1x8x286xbf16> to vector<8x286xbf16>
    %38 = vector.shape_cast %35 : vector<8x286xbf16> to vector<1x8x286xbf16>
    tpu.vector_store %arg4[%c0_35, %c0_36, %c0_37], %38 {strides = array<i32>} : memref<1x8x286xbf16, #tpu.memory_space<vmem>>, vector<1x8x286xbf16>,
    return
  }
  func.func @transform_0(%arg0: i32) -> (i32, i32, i32) {
    %c0_i32 = arith.constant 0 : i32
    %c0_i32_0 = arith.constant 0 : i32
    %c0_i32_1 = arith.constant 0 : i32
    return %arg0, %c0_i32, %c0_i32_0 : i32, i32, i32
  }
  func.func @transform_1(%arg0: i32) -> (i32, i32) {
    %c0_i32 = arith.constant 0 : i32
    %c0_i32_0 = arith.constant 0 : i32
    %c0_i32_1 = arith.constant 0 : i32
    return %c0_i32, %c0_i32_0 : i32, i32
  }
  func.func @transform_2(%arg0: i32) -> (i32, i32) {
    %c0_i32 = arith.constant 0 : i32
    %c0_i32_0 = arith.constant 0 : i32
    %c0_i32_1 = arith.constant 0 : i32
    return %c0_i32, %c0_i32_0 : i32, i32
  }
  func.func @transform_3(%arg0: i32) -> (i32, i32, i32) {
    %c0_i32 = arith.constant 0 : i32
    %c0_i32_0 = arith.constant 0 : i32
    %c0_i32_1 = arith.constant 0 : i32
    return %arg0, %c0_i32, %c0_i32_0 : i32, i32, i32
  }
}

module attributes {stable_mosaic.version = 11 : i64} {
  func.func @_matmul_bias_relu_kernel(%arg0: i32, %arg1: i32, %arg2: memref<1x8x256xbf16, #tpu.memory_space<vmem>>, %arg3: memref<8x8xbf16, #tpu.memory_space<vmem>>, %arg4: memref<8x1xf32, #tpu.memory_space<vmem>>, %arg5: memref<1x8x256xbf16, #tpu.memory_space<vmem>>) attributes {dimension_semantics = [#tpu.dimension_semantics<parallel>, #tpu.dimension_semantics<parallel>], iteration_bounds = array<i64: 2, 1>, scalar_prefetch = 0 : i64, scratch_operands = 0 : i64, tpu.core_type = #tpu.core_type<tc>, window_params = [{transform_indices = @transform_0, window_bounds = array<i64: 1, 8, 256>}, {pipeline_mode = #tpu.pipeline_mode<synchronous>, transform_indices = @transform_1, window_bounds = array<i64: 8, 8>}, {pipeline_mode = #tpu.pipeline_mode<synchronous>, transform_indices = @transform_2, window_bounds = array<i64: 8, 1>}, {transform_indices = @transform_3, window_bounds = array<i64: 1, 8, 256>}]} {
    %c0 = arith.constant 0 : index
    %c0_0 = arith.constant 0 : index
    %0 = vector.load %arg3[%c0, %c0_0] : memref<8x8xbf16, #tpu.memory_space<vmem>>, vector<8x8xbf16>
    %c0_1 = arith.constant 0 : index
    %c0_2 = arith.constant 0 : index
    %c0_3 = arith.constant 0 : index
    %1 = vector.load %arg2[%c0_1, %c0_2, %c0_3] : memref<1x8x256xbf16, #tpu.memory_space<vmem>>, vector<1x8x256xbf16>
    %2 = vector.shape_cast %1 : vector<1x8x256xbf16> to vector<8x256xbf16>
    %cst = arith.constant dense<0.000000e+00> : vector<8x256xf32>
    %3 = tpu.matmul %0, %2, %cst {dimension_numbers = #tpu.dot_dimension_numbers<[1], [0], [0], [1], [0, 0, 1, 1], [], []>} : vector<8x8xbf16>, vector<8x256xbf16>, vector<8x256xf32> -> vector<8x256xf32>
    %c0_4 = arith.constant 0 : index
    %c0_5 = arith.constant 0 : index
    %4 = vector.load %arg4[%c0_4, %c0_5] : memref<8x1xf32, #tpu.memory_space<vmem>>, vector<8x1xf32>
    %5 = vector.broadcast %4 : vector<8x1xf32> to vector<8x256xf32>
    %6 = arith.addf %3, %5 : vector<8x256xf32>
    %cst_6 = arith.constant 0.000000e+00 : f32
    %7 = vector.broadcast %cst_6 : f32 to vector<8x256xf32>
    %8 = arith.maximumf %6, %7 : vector<8x256xf32>
    %9 = arith.truncf %8 : vector<8x256xf32> to vector<8x256xbf16>
    %c0_7 = arith.constant 0 : index
    %c0_8 = arith.constant 0 : index
    %c0_9 = arith.constant 0 : index
    %10 = vector.load %arg5[%c0_7, %c0_8, %c0_9] : memref<1x8x256xbf16, #tpu.memory_space<vmem>>, vector<1x8x256xbf16>
    %11 = vector.shape_cast %10 : vector<1x8x256xbf16> to vector<8x256xbf16>
    %12 = vector.shape_cast %9 : vector<8x256xbf16> to vector<1x8x256xbf16>
    tpu.vector_store %arg5[%c0_7, %c0_8, %c0_9], %12 {strides = array<i32>} : memref<1x8x256xbf16, #tpu.memory_space<vmem>>, vector<1x8x256xbf16>,
    return
  }
  func.func @transform_0(%arg0: i32, %arg1: i32) -> (i32, i32, i32) {
    %c0_i32 = arith.constant 0 : i32
    %c0_i32_0 = arith.constant 0 : i32
    return %arg0, %c0_i32, %arg1 : i32, i32, i32
  }
  func.func @transform_1(%arg0: i32, %arg1: i32) -> (i32, i32) {
    %c0_i32 = arith.constant 0 : i32
    %c0_i32_0 = arith.constant 0 : i32
    %c0_i32_1 = arith.constant 0 : i32
    return %c0_i32, %c0_i32_0 : i32, i32
  }
  func.func @transform_2(%arg0: i32, %arg1: i32) -> (i32, i32) {
    %c0_i32 = arith.constant 0 : i32
    %c0_i32_0 = arith.constant 0 : i32
    %c0_i32_1 = arith.constant 0 : i32
    return %c0_i32, %c0_i32_0 : i32, i32
  }
  func.func @transform_3(%arg0: i32, %arg1: i32) -> (i32, i32, i32) {
    %c0_i32 = arith.constant 0 : i32
    %c0_i32_0 = arith.constant 0 : i32
    return %arg0, %c0_i32, %arg1 : i32, i32, i32
  }
}

module attributes {stable_mosaic.version = 11 : i64} {
  func.func @_matmul_bias_relu_kernel(%arg0: i32, %arg1: i32, %arg2: memref<1x72x64xbf16, #tpu.memory_space<vmem>>, %arg3: memref<16x72xbf16, #tpu.memory_space<vmem>>, %arg4: memref<16x1xf32, #tpu.memory_space<vmem>>, %arg5: memref<1x16x64xbf16, #tpu.memory_space<vmem>>) attributes {dimension_semantics = [#tpu.dimension_semantics<parallel>, #tpu.dimension_semantics<parallel>], iteration_bounds = array<i64: 2, 1>, scalar_prefetch = 0 : i64, scratch_operands = 0 : i64, tpu.core_type = #tpu.core_type<tc>, window_params = [{transform_indices = @transform_0, window_bounds = array<i64: 1, 72, 64>}, {pipeline_mode = #tpu.pipeline_mode<synchronous>, transform_indices = @transform_1, window_bounds = array<i64: 16, 72>}, {pipeline_mode = #tpu.pipeline_mode<synchronous>, transform_indices = @transform_2, window_bounds = array<i64: 16, 1>}, {transform_indices = @transform_3, window_bounds = array<i64: 1, 16, 64>}]} {
    %c0 = arith.constant 0 : index
    %c0_0 = arith.constant 0 : index
    %0 = vector.load %arg3[%c0, %c0_0] : memref<16x72xbf16, #tpu.memory_space<vmem>>, vector<16x72xbf16>
    %c0_1 = arith.constant 0 : index
    %c0_2 = arith.constant 0 : index
    %c0_3 = arith.constant 0 : index
    %1 = vector.load %arg2[%c0_1, %c0_2, %c0_3] : memref<1x72x64xbf16, #tpu.memory_space<vmem>>, vector<1x72x64xbf16>
    %2 = vector.shape_cast %1 : vector<1x72x64xbf16> to vector<72x64xbf16>
    %cst = arith.constant dense<0.000000e+00> : vector<16x64xf32>
    %3 = tpu.matmul %0, %2, %cst {dimension_numbers = #tpu.dot_dimension_numbers<[1], [0], [0], [1], [0, 0, 1, 1], [], []>} : vector<16x72xbf16>, vector<72x64xbf16>, vector<16x64xf32> -> vector<16x64xf32>
    %c0_4 = arith.constant 0 : index
    %c0_5 = arith.constant 0 : index
    %4 = vector.load %arg4[%c0_4, %c0_5] : memref<16x1xf32, #tpu.memory_space<vmem>>, vector<16x1xf32>
    %5 = vector.broadcast %4 : vector<16x1xf32> to vector<16x64xf32>
    %6 = arith.addf %3, %5 : vector<16x64xf32>
    %cst_6 = arith.constant 0.000000e+00 : f32
    %7 = vector.broadcast %cst_6 : f32 to vector<16x64xf32>
    %8 = arith.maximumf %6, %7 : vector<16x64xf32>
    %9 = arith.truncf %8 : vector<16x64xf32> to vector<16x64xbf16>
    %c0_7 = arith.constant 0 : index
    %c0_8 = arith.constant 0 : index
    %c0_9 = arith.constant 0 : index
    %10 = vector.load %arg5[%c0_7, %c0_8, %c0_9] : memref<1x16x64xbf16, #tpu.memory_space<vmem>>, vector<1x16x64xbf16>
    %11 = vector.shape_cast %10 : vector<1x16x64xbf16> to vector<16x64xbf16>
    %12 = vector.shape_cast %9 : vector<16x64xbf16> to vector<1x16x64xbf16>
    tpu.vector_store %arg5[%c0_7, %c0_8, %c0_9], %12 {strides = array<i32>} : memref<1x16x64xbf16, #tpu.memory_space<vmem>>, vector<1x16x64xbf16>,
    return
  }
  func.func @transform_0(%arg0: i32, %arg1: i32) -> (i32, i32, i32) {
    %c0_i32 = arith.constant 0 : i32
    %c0_i32_0 = arith.constant 0 : i32
    return %arg0, %c0_i32, %arg1 : i32, i32, i32
  }
  func.func @transform_1(%arg0: i32, %arg1: i32) -> (i32, i32) {
    %c0_i32 = arith.constant 0 : i32
    %c0_i32_0 = arith.constant 0 : i32
    %c0_i32_1 = arith.constant 0 : i32
    return %c0_i32, %c0_i32_0 : i32, i32
  }
  func.func @transform_2(%arg0: i32, %arg1: i32) -> (i32, i32) {
    %c0_i32 = arith.constant 0 : i32
    %c0_i32_0 = arith.constant 0 : i32
    %c0_i32_1 = arith.constant 0 : i32
    return %c0_i32, %c0_i32_0 : i32, i32
  }
  func.func @transform_3(%arg0: i32, %arg1: i32) -> (i32, i32, i32) {
    %c0_i32 = arith.constant 0 : i32
    %c0_i32_0 = arith.constant 0 : i32
    return %arg0, %c0_i32, %arg1 : i32, i32, i32
  }
}

module attributes {stable_mosaic.version = 11 : i64} {
  func.func @_conv3x3_s1_kernel(%arg0: i32, %arg1: memref<1x16x100xbf16, #tpu.memory_space<vmem>>, %arg2: memref<16x144xbf16, #tpu.memory_space<vmem>>, %arg3: memref<16x1xf32, #tpu.memory_space<vmem>>, %arg4: memref<1x16x78xbf16, #tpu.memory_space<vmem>>, %arg5: memref<144x78xbf16, #tpu.memory_space<vmem>>) attributes {dimension_semantics = [#tpu.dimension_semantics<parallel>], iteration_bounds = array<i64: 2>, scalar_prefetch = 0 : i64, scratch_operands = 1 : i64, tpu.core_type = #tpu.core_type<tc>, window_params = [{transform_indices = @transform_0, window_bounds = array<i64: 1, 16, 100>}, {pipeline_mode = #tpu.pipeline_mode<synchronous>, transform_indices = @transform_1, window_bounds = array<i64: 16, 144>}, {pipeline_mode = #tpu.pipeline_mode<synchronous>, transform_indices = @transform_2, window_bounds = array<i64: 16, 1>}, {transform_indices = @transform_3, window_bounds = array<i64: 1, 16, 78>}]} {
    %c0 = arith.constant 0 : index
    %c0_0 = arith.constant 0 : index
    %c0_1 = arith.constant 0 : index
    %0 = vector.load %arg1[%c0, %c0_0, %c0_1] : memref<1x16x100xbf16, #tpu.memory_space<vmem>>, vector<1x16x78xbf16>
    %1 = vector.shape_cast %0 : vector<1x16x78xbf16> to vector<16x78xbf16>
    %c0_2 = arith.constant 0 : index
    %c0_3 = arith.constant 0 : index
    %2 = vector.load %arg5[%c0_2, %c0_3] : memref<144x78xbf16, #tpu.memory_space<vmem>>, vector<16x78xbf16>
    tpu.vector_store %arg5[%c0_2, %c0_3], %1 {strides = array<i32>} : memref<144x78xbf16, #tpu.memory_space<vmem>>, vector<16x78xbf16>,
    %c0_4 = arith.constant 0 : index
    %c0_5 = arith.constant 0 : index
    %c1 = arith.constant 1 : index
    %3 = vector.load %arg1[%c0_4, %c0_5, %c1] : memref<1x16x100xbf16, #tpu.memory_space<vmem>>, vector<1x16x78xbf16>
    %4 = vector.shape_cast %3 : vector<1x16x78xbf16> to vector<16x78xbf16>
    %c16 = arith.constant 16 : index
    %c0_6 = arith.constant 0 : index
    %5 = vector.load %arg5[%c16, %c0_6] : memref<144x78xbf16, #tpu.memory_space<vmem>>, vector<16x78xbf16>
    tpu.vector_store %arg5[%c16, %c0_6], %4 {strides = array<i32>} : memref<144x78xbf16, #tpu.memory_space<vmem>>, vector<16x78xbf16>,
    %c0_7 = arith.constant 0 : index
    %c0_8 = arith.constant 0 : index
    %c2 = arith.constant 2 : index
    %6 = vector.load %arg1[%c0_7, %c0_8, %c2] : memref<1x16x100xbf16, #tpu.memory_space<vmem>>, vector<1x16x78xbf16>
    %7 = vector.shape_cast %6 : vector<1x16x78xbf16> to vector<16x78xbf16>
    %c32 = arith.constant 32 : index
    %c0_9 = arith.constant 0 : index
    %8 = vector.load %arg5[%c32, %c0_9] : memref<144x78xbf16, #tpu.memory_space<vmem>>, vector<16x78xbf16>
    tpu.vector_store %arg5[%c32, %c0_9], %7 {strides = array<i32>} : memref<144x78xbf16, #tpu.memory_space<vmem>>, vector<16x78xbf16>,
    %c0_10 = arith.constant 0 : index
    %c0_11 = arith.constant 0 : index
    %c10 = arith.constant 10 : index
    %9 = vector.load %arg1[%c0_10, %c0_11, %c10] : memref<1x16x100xbf16, #tpu.memory_space<vmem>>, vector<1x16x78xbf16>
    %10 = vector.shape_cast %9 : vector<1x16x78xbf16> to vector<16x78xbf16>
    %c48 = arith.constant 48 : index
    %c0_12 = arith.constant 0 : index
    %11 = vector.load %arg5[%c48, %c0_12] : memref<144x78xbf16, #tpu.memory_space<vmem>>, vector<16x78xbf16>
    tpu.vector_store %arg5[%c48, %c0_12], %10 {strides = array<i32>} : memref<144x78xbf16, #tpu.memory_space<vmem>>, vector<16x78xbf16>,
    %c0_13 = arith.constant 0 : index
    %c0_14 = arith.constant 0 : index
    %c11 = arith.constant 11 : index
    %12 = vector.load %arg1[%c0_13, %c0_14, %c11] : memref<1x16x100xbf16, #tpu.memory_space<vmem>>, vector<1x16x78xbf16>
    %13 = vector.shape_cast %12 : vector<1x16x78xbf16> to vector<16x78xbf16>
    %c64 = arith.constant 64 : index
    %c0_15 = arith.constant 0 : index
    %14 = vector.load %arg5[%c64, %c0_15] : memref<144x78xbf16, #tpu.memory_space<vmem>>, vector<16x78xbf16>
    tpu.vector_store %arg5[%c64, %c0_15], %13 {strides = array<i32>} : memref<144x78xbf16, #tpu.memory_space<vmem>>, vector<16x78xbf16>,
    %c0_16 = arith.constant 0 : index
    %c0_17 = arith.constant 0 : index
    %c12 = arith.constant 12 : index
    %15 = vector.load %arg1[%c0_16, %c0_17, %c12] : memref<1x16x100xbf16, #tpu.memory_space<vmem>>, vector<1x16x78xbf16>
    %16 = vector.shape_cast %15 : vector<1x16x78xbf16> to vector<16x78xbf16>
    %c80 = arith.constant 80 : index
    %c0_18 = arith.constant 0 : index
    %17 = vector.load %arg5[%c80, %c0_18] : memref<144x78xbf16, #tpu.memory_space<vmem>>, vector<16x78xbf16>
    tpu.vector_store %arg5[%c80, %c0_18], %16 {strides = array<i32>} : memref<144x78xbf16, #tpu.memory_space<vmem>>, vector<16x78xbf16>,
    %c0_19 = arith.constant 0 : index
    %c0_20 = arith.constant 0 : index
    %c20 = arith.constant 20 : index
    %18 = vector.load %arg1[%c0_19, %c0_20, %c20] : memref<1x16x100xbf16, #tpu.memory_space<vmem>>, vector<1x16x78xbf16>
    %19 = vector.shape_cast %18 : vector<1x16x78xbf16> to vector<16x78xbf16>
    %c96 = arith.constant 96 : index
    %c0_21 = arith.constant 0 : index
    %20 = vector.load %arg5[%c96, %c0_21] : memref<144x78xbf16, #tpu.memory_space<vmem>>, vector<16x78xbf16>
    tpu.vector_store %arg5[%c96, %c0_21], %19 {strides = array<i32>} : memref<144x78xbf16, #tpu.memory_space<vmem>>, vector<16x78xbf16>,
    %c0_22 = arith.constant 0 : index
    %c0_23 = arith.constant 0 : index
    %c21 = arith.constant 21 : index
    %21 = vector.load %arg1[%c0_22, %c0_23, %c21] : memref<1x16x100xbf16, #tpu.memory_space<vmem>>, vector<1x16x78xbf16>
    %22 = vector.shape_cast %21 : vector<1x16x78xbf16> to vector<16x78xbf16>
    %c112 = arith.constant 112 : index
    %c0_24 = arith.constant 0 : index
    %23 = vector.load %arg5[%c112, %c0_24] : memref<144x78xbf16, #tpu.memory_space<vmem>>, vector<16x78xbf16>
    tpu.vector_store %arg5[%c112, %c0_24], %22 {strides = array<i32>} : memref<144x78xbf16, #tpu.memory_space<vmem>>, vector<16x78xbf16>,
    %c0_25 = arith.constant 0 : index
    %c0_26 = arith.constant 0 : index
    %c22 = arith.constant 22 : index
    %24 = vector.load %arg1[%c0_25, %c0_26, %c22] : memref<1x16x100xbf16, #tpu.memory_space<vmem>>, vector<1x16x78xbf16>
    %25 = vector.shape_cast %24 : vector<1x16x78xbf16> to vector<16x78xbf16>
    %c128 = arith.constant 128 : index
    %c0_27 = arith.constant 0 : index
    %26 = vector.load %arg5[%c128, %c0_27] : memref<144x78xbf16, #tpu.memory_space<vmem>>, vector<16x78xbf16>
    tpu.vector_store %arg5[%c128, %c0_27], %25 {strides = array<i32>} : memref<144x78xbf16, #tpu.memory_space<vmem>>, vector<16x78xbf16>,
    %c0_28 = arith.constant 0 : index
    %c0_29 = arith.constant 0 : index
    %27 = vector.load %arg2[%c0_28, %c0_29] : memref<16x144xbf16, #tpu.memory_space<vmem>>, vector<16x144xbf16>
    %c0_30 = arith.constant 0 : index
    %c0_31 = arith.constant 0 : index
    %28 = vector.load %arg5[%c0_30, %c0_31] : memref<144x78xbf16, #tpu.memory_space<vmem>>, vector<144x78xbf16>
    %cst = arith.constant dense<0.000000e+00> : vector<16x78xf32>
    %29 = tpu.matmul %27, %28, %cst {dimension_numbers = #tpu.dot_dimension_numbers<[1], [0], [0], [1], [0, 0, 1, 1], [], []>} : vector<16x144xbf16>, vector<144x78xbf16>, vector<16x78xf32> -> vector<16x78xf32>
    %c0_32 = arith.constant 0 : index
    %c0_33 = arith.constant 0 : index
    %30 = vector.load %arg3[%c0_32, %c0_33] : memref<16x1xf32, #tpu.memory_space<vmem>>, vector<16x1xf32>
    %31 = vector.broadcast %30 : vector<16x1xf32> to vector<16x78xf32>
    %32 = arith.addf %29, %31 : vector<16x78xf32>
    %cst_34 = arith.constant 0.000000e+00 : f32
    %33 = vector.broadcast %cst_34 : f32 to vector<16x78xf32>
    %34 = arith.maximumf %32, %33 : vector<16x78xf32>
    %35 = arith.truncf %34 : vector<16x78xf32> to vector<16x78xbf16>
    %c0_35 = arith.constant 0 : index
    %c0_36 = arith.constant 0 : index
    %c0_37 = arith.constant 0 : index
    %36 = vector.load %arg4[%c0_35, %c0_36, %c0_37] : memref<1x16x78xbf16, #tpu.memory_space<vmem>>, vector<1x16x78xbf16>
    %37 = vector.shape_cast %36 : vector<1x16x78xbf16> to vector<16x78xbf16>
    %38 = vector.shape_cast %35 : vector<16x78xbf16> to vector<1x16x78xbf16>
    tpu.vector_store %arg4[%c0_35, %c0_36, %c0_37], %38 {strides = array<i32>} : memref<1x16x78xbf16, #tpu.memory_space<vmem>>, vector<1x16x78xbf16>,
    return
  }
  func.func @transform_0(%arg0: i32) -> (i32, i32, i32) {
    %c0_i32 = arith.constant 0 : i32
    %c0_i32_0 = arith.constant 0 : i32
    %c0_i32_1 = arith.constant 0 : i32
    return %arg0, %c0_i32, %c0_i32_0 : i32, i32, i32
  }
  func.func @transform_1(%arg0: i32) -> (i32, i32) {
    %c0_i32 = arith.constant 0 : i32
    %c0_i32_0 = arith.constant 0 : i32
    %c0_i32_1 = arith.constant 0 : i32
    return %c0_i32, %c0_i32_0 : i32, i32
  }
  func.func @transform_2(%arg0: i32) -> (i32, i32) {
    %c0_i32 = arith.constant 0 : i32
    %c0_i32_0 = arith.constant 0 : i32
    %c0_i32_1 = arith.constant 0 : i32
    return %c0_i32, %c0_i32_0 : i32, i32
  }
  func.func @transform_3(%arg0: i32) -> (i32, i32, i32) {
    %c0_i32 = arith.constant 0 : i32
    %c0_i32_0 = arith.constant 0 : i32
    %c0_i32_1 = arith.constant 0 : i32
    return %arg0, %c0_i32, %c0_i32_0 : i32, i32, i32
  }
}

module attributes {stable_mosaic.version = 11 : i64} {
  func.func @_matmul_bias_relu_kernel(%arg0: i32, %arg1: i32, %arg2: memref<1x16x64xbf16, #tpu.memory_space<vmem>>, %arg3: memref<32x16xbf16, #tpu.memory_space<vmem>>, %arg4: memref<32x1xf32, #tpu.memory_space<vmem>>, %arg5: memref<1x32x64xbf16, #tpu.memory_space<vmem>>) attributes {dimension_semantics = [#tpu.dimension_semantics<parallel>, #tpu.dimension_semantics<parallel>], iteration_bounds = array<i64: 2, 1>, scalar_prefetch = 0 : i64, scratch_operands = 0 : i64, tpu.core_type = #tpu.core_type<tc>, window_params = [{transform_indices = @transform_0, window_bounds = array<i64: 1, 16, 64>}, {pipeline_mode = #tpu.pipeline_mode<synchronous>, transform_indices = @transform_1, window_bounds = array<i64: 32, 16>}, {pipeline_mode = #tpu.pipeline_mode<synchronous>, transform_indices = @transform_2, window_bounds = array<i64: 32, 1>}, {transform_indices = @transform_3, window_bounds = array<i64: 1, 32, 64>}]} {
    %c0 = arith.constant 0 : index
    %c0_0 = arith.constant 0 : index
    %0 = vector.load %arg3[%c0, %c0_0] : memref<32x16xbf16, #tpu.memory_space<vmem>>, vector<32x16xbf16>
    %c0_1 = arith.constant 0 : index
    %c0_2 = arith.constant 0 : index
    %c0_3 = arith.constant 0 : index
    %1 = vector.load %arg2[%c0_1, %c0_2, %c0_3] : memref<1x16x64xbf16, #tpu.memory_space<vmem>>, vector<1x16x64xbf16>
    %2 = vector.shape_cast %1 : vector<1x16x64xbf16> to vector<16x64xbf16>
    %cst = arith.constant dense<0.000000e+00> : vector<32x64xf32>
    %3 = tpu.matmul %0, %2, %cst {dimension_numbers = #tpu.dot_dimension_numbers<[1], [0], [0], [1], [0, 0, 1, 1], [], []>} : vector<32x16xbf16>, vector<16x64xbf16>, vector<32x64xf32> -> vector<32x64xf32>
    %c0_4 = arith.constant 0 : index
    %c0_5 = arith.constant 0 : index
    %4 = vector.load %arg4[%c0_4, %c0_5] : memref<32x1xf32, #tpu.memory_space<vmem>>, vector<32x1xf32>
    %5 = vector.broadcast %4 : vector<32x1xf32> to vector<32x64xf32>
    %6 = arith.addf %3, %5 : vector<32x64xf32>
    %cst_6 = arith.constant 0.000000e+00 : f32
    %7 = vector.broadcast %cst_6 : f32 to vector<32x64xf32>
    %8 = arith.maximumf %6, %7 : vector<32x64xf32>
    %9 = arith.truncf %8 : vector<32x64xf32> to vector<32x64xbf16>
    %c0_7 = arith.constant 0 : index
    %c0_8 = arith.constant 0 : index
    %c0_9 = arith.constant 0 : index
    %10 = vector.load %arg5[%c0_7, %c0_8, %c0_9] : memref<1x32x64xbf16, #tpu.memory_space<vmem>>, vector<1x32x64xbf16>
    %11 = vector.shape_cast %10 : vector<1x32x64xbf16> to vector<32x64xbf16>
    %12 = vector.shape_cast %9 : vector<32x64xbf16> to vector<1x32x64xbf16>
    tpu.vector_store %arg5[%c0_7, %c0_8, %c0_9], %12 {strides = array<i32>} : memref<1x32x64xbf16, #tpu.memory_space<vmem>>, vector<1x32x64xbf16>,
    return
  }
  func.func @transform_0(%arg0: i32, %arg1: i32) -> (i32, i32, i32) {
    %c0_i32 = arith.constant 0 : i32
    %c0_i32_0 = arith.constant 0 : i32
    return %arg0, %c0_i32, %arg1 : i32, i32, i32
  }
  func.func @transform_1(%arg0: i32, %arg1: i32) -> (i32, i32) {
    %c0_i32 = arith.constant 0 : i32
    %c0_i32_0 = arith.constant 0 : i32
    %c0_i32_1 = arith.constant 0 : i32
    return %c0_i32, %c0_i32_0 : i32, i32
  }
  func.func @transform_2(%arg0: i32, %arg1: i32) -> (i32, i32) {
    %c0_i32 = arith.constant 0 : i32
    %c0_i32_0 = arith.constant 0 : i32
    %c0_i32_1 = arith.constant 0 : i32
    return %c0_i32, %c0_i32_0 : i32, i32
  }
  func.func @transform_3(%arg0: i32, %arg1: i32) -> (i32, i32, i32) {
    %c0_i32 = arith.constant 0 : i32
    %c0_i32_0 = arith.constant 0 : i32
    return %arg0, %c0_i32, %arg1 : i32, i32, i32
  }
}

</mosaic_0001>

<bundles_post_ra>
// kernel: tile.6
= control target key start
LH: loop header
LB: loop body
LE: loop exit
PB: predicated region body
PF: predicated region fallthrough
CT: control target
= control target key end

     0   :  { %s22_s0 = inlined_call_operand.vmem [shape: f32[8], index: 0, kind: input, shape index: {}]   ;;  %s23_s1 = inlined_call_operand.vmem [shape: f32[4,8], index: 1, kind: output, shape index: {}]  }
   0x1   :  { %v4_v0 = vld [vmem:[%s22_s0] ss:$0 sm:$0xff] }
   0x2   :  { %5 = vst [vmem:[%s23_s1] sm:$0xf] %v4_v0 }

// kernel: tile.0
= control target key start
LH: loop header
LB: loop body
LE: loop exit
PB: predicated region body
PF: predicated region fallthrough
CT: control target
= control target key end

     0   :  { %s66_s8 = smov 125   ;;  %vm7_vm0 = vcmask 7168   ;;  %s67_s11 = smov 126   ;;  %s117_s0 = inlined_call_operand.vmem [shape: f32[4,8], index: 0, kind: input, shape index: {}]   ;;  %s118_s1 = inlined_call_operand.vmem [shape: f32[32,1], index: 1, kind: output, shape index: {}]  }
   0x1   :  { %v4_v0 = vld [vmem:[%s117_s0] sm:$0xf]  ;;  %s65_s0 = smov 127   ;;  %s68_s12 = smov 124  }
   0x2   :  { %5 = vst [vmem:[#allocation0] sm:$0xf] %v4_v0  ;;  %s69_s13 = smov 123   ;;  %s70_s14 = smov 122  }
   0x3   :  { %s71_s15 = smov 121  }
   0x9   :  { %v9_v1 = vld [vmem:[#allocation0] sm:$0xf]  }
   0xa   :  { %v21_v2 = vld [vmem:[#allocation0] sm:$0xf]   ;;  %10 = vrot.lane.b32.xlu0 %v9_v1, %s65_s0 }
   0xb   :  { %22 = vrot.lane.b32.xlu1 %v21_v2, %s66_s8  ;;  %v15_v3 = vld [vmem:[#allocation0] sm:$0xf]  }
   0xc   :  { %v27_v4 = vld [vmem:[#allocation0] sm:$0xf]  }
   0xd   :  { %v6_v5 = vld [vmem:[#allocation0] sm:$0xf]  }
   0xe   :  { %8 = vst.msk [vmem:[%s118_s1] ss:$8 sm:$0xf] %vm7_vm0, %v6_v5   ;;  %16 = vrot.lane.b32.xlu0 %v15_v3, %s67_s11  ;;  %v33_v6 = vld [vmem:[#allocation0] sm:$0xf]  }
   0xf   :  { %28 = vrot.lane.b32.xlu1 %v27_v4, %s68_s12  ;;  %v39_v7 = vld [vmem:[#allocation0] sm:$0xf]  }
  0x10   :  { %v45_v8 = vld [vmem:[#allocation0] sm:$0xf]  }
  0x12   :  { %34 = vrot.lane.b32.xlu0 %v33_v6, %s69_s13 }
  0x13   :  { %40 = vrot.lane.b32.xlu1 %v39_v7, %s70_s14 }
  0x16   :  { %46 = vrot.lane.b32.xlu0 %v45_v8, %s71_s15 }
  0x7c   :  { %v11_v9 = vpop.permute.xlu0 %10  }
  0x7d   :  { %v23_v10 = vpop.permute.xlu1 %22   ;;  %51 = vst.msk [vmem:[%s118_s1 + $0x1] ss:$8 sm:$0xf] %vm7_vm0, %v11_v9  }
  0x7e   :  { %53 = vst.msk [vmem:[%s118_s1 + $0x3] ss:$8 sm:$0xf] %vm7_vm0, %v23_v10  }
  0x80   :  { %v17_v11 = vpop.permute.xlu0 %16  }
  0x81   :  { %v29_v12 = vpop.permute.xlu1 %28   ;;  %52 = vst.msk [vmem:[%s118_s1 + $0x2] ss:$8 sm:$0xf] %vm7_vm0, %v17_v11  }
  0x82   :  { %54 = vst.msk [vmem:[%s118_s1 + $0x4] ss:$8 sm:$0xf] %vm7_vm0, %v29_v12  }
  0x84   :  { %v35_v13 = vpop.permute.xlu0 %34  }
  0x85   :  { %v41_v14 = vpop.permute.xlu1 %40   ;;  %55 = vst.msk [vmem:[%s118_s1 + $0x5] ss:$8 sm:$0xf] %vm7_vm0, %v35_v13  }
  0x86   :  { %56 = vst.msk [vmem:[%s118_s1 + $0x6] ss:$8 sm:$0xf] %vm7_vm0, %v41_v14  }
  0x88   :  { %v47_v15 = vpop.permute.xlu0 %46  }
  0x89   :  { %57 = vst.msk [vmem:[%s118_s1 + $0x7] ss:$8 sm:$0xf] %vm7_vm0, %v47_v15  }

// kernel: _lambda_.8
= control target key start
LH: loop header
LB: loop body
LE: loop exit
PB: predicated region body
PF: predicated region fallthrough
CT: control target
= control target key end

     0   :  { %s466_s12 = smov 0   ;;  %s468_s13 = smov 0   ;;  %s505_s0 = inlined_call_operand.vmem [shape: bf16[2,8,256], index: 0, kind: input, shape index: {}]   ;;  %s506_s1 = inlined_call_operand.vmem [shape: bf16[8,8], index: 1, kind: input, shape index: {}]   ;;  %s507_s2 = inlined_call_operand.vmem [shape: f32[8,1], index: 2, kind: input, shape index: {}]   ;;  %s508_s3 = inlined_call_operand.vmem [shape: bf16[2,8,256], index: 3, kind: output, shape index: {}]  }
   0x1   :  { %s470_s14 = smov 0  }
   0x2 LB: > { %s25_s15 = sadd.s32 1, %s439_s13  ;;  %p378_p0 = scmp.ge.s32.totalorder %s443_s14, 1  ;;  %s443_s14 = sphi %s470_s14, %s13_s14   ;;  %s439_s13 = sphi %s468_s13, %s510_s13   ;;  %s435_s12 = sphi %s466_s12, %s509_s12  }
   0x3   : > { %p27_p1 = scmp.ge.s32.totalorder %s25_s15, 2  ;;  %p158_p2 = scmp.lt.s32.totalorder %s443_s14, 3 }
   0x5   : > { %s512_s15 = smov (%p27_p1, %s25_s15), 0  ;;  %p159_p3 = pnand %p378_p0, %p158_p2 }
   0x6   : > { %p191_p4 = scmp.lt.s32.totalorder (!%p159_p3), %s435_s12, 1  ;;  %v445_v0 = vmov (!%p159_p3), 0   ;;  %v213_v1 = vld [vmem:[%s507_s2] sm:$0xff] (!%p159_p3)  ;;  %vm228_vm0 = vcmask (!%p159_p3), 1043456   ;;  %vm224_vm1 = vcmask (!%p159_p3), 64512  }
   0x7   : > { %162 = sbr.rel (%p159_p3) target bundleno = 244 (0xf4), region = 32  ;;  %267 = vmatprep.mubr.bf16.mxu0 (!%p159_p3), %v445_v0  ;;  %418 = vset.pattern.permute.xlu0 (!%p159_p3), %v445_v0  ;;  %v211_v6 = vld [vmem:[%s506_s1] sm:$0xf] (!%p159_p3) }
   0x8   : > { %216 = vperm.xlu0 (!%p159_p3), %418, %v213_v1  }
   0xe   : > { %s514_s12 = smov (!%p191_p4, %s435_s12), 1 }
   0xf   : > { %s390_s18 = sshll.u32 %s514_s12, 3 }
  0x10   : > { %s198_s21 = scalar_lea.vmem %s505_s0, %s390_s18  ;;  %s208_s26 = scalar_lea.vmem %s508_s3, %s390_s18 }
  0x11   : > { %v212_v2 = vld [vmem:[%s198_s21] sm:$0xff] }
  0x12   : > { %v384_v3 = vcombine.high %v212_v2, %v212_v2  ;;  %v383_v4 = vcombine.low %v212_v2, %v212_v2 }
  0x14   : > { %385 = vmatprep.subr.msk.bf16.mxu0 %vm228_vm0, %v384_v3  ;;  %v230_v5 = vsel %vm228_vm0, %v383_v4, 0 }
  0x15   : > { %236 = vmatpush1.bf16.msra.mxu0 %v230_v5 }
  0x18   : > { %386 = vmatmul.mubr.msk.bf16.vlgmr.msra.gmra.mrb[0].mxu0 %vm224_vm1, %v211_v6 }
  0x87   : > { %v217_v7 = vpop.permute.xlu0 %216 }
  0xeb   : > { %v269_v8 = vpop.f32.mrb[0].mxu0 }
  0xec   : > { %v270_v9 = vadd.f32 %v269_v8, %v217_v7  ;;  %v271_v10 = vpop.f32.mrb[1].mxu0 }
  0xed   : > { %v272_v11 = vadd.f32 %v271_v10, %v217_v7  ;;  %v273_v12 = vpop.f32.mrb[2].mxu0 }
  0xee   : > { %v276_v13 = vmax.f32 %v270_v9, 0.0  ;;  %v274_v14 = vpop.f32.mrb[3].mxu0 }
  0xef   : > { %v277_v15 = vmax.f32 %v272_v11, 0.0 }
  0xf1   : > { %v392_v16 = vpack.c.bf16 %v277_v15, %v276_v13 }
  0xf3   : > { %286 = vst [vmem:[%s208_s26] sm:$0xff] %v392_v16 }
  0xf4 PF: > { %s13_s14 = sadd.s32 1, %s443_s14   ;;  %s509_s12 = smov %s439_s13 }
  0xf5   : > { %p10_p5 = scmp.ge.s32.totalorder %s13_s14, 4   ;;  %s510_s13 = smov %s512_s15 }
  0xf7   :  { %12 = sbr.rel (!%p10_p5) target bundleno = 2 (0x2), region = 62 }

// kernel: _lambda_.6
= control target key start
LH: loop header
LB: loop body
LE: loop exit
PB: predicated region body
PF: predicated region fallthrough
CT: control target
= control target key end

     0   :  { %s695_s12 = smov 0   ;;  %s777_s0 = inlined_call_operand.vmem [shape: bf16[2,8,324], index: 0, kind: input, shape index: {}]   ;;  %s778_s1 = inlined_call_operand.vmem [shape: bf16[8,72], index: 1, kind: input, shape index: {}]   ;;  %s779_s2 = inlined_call_operand.vmem [shape: f32[8,1], index: 2, kind: input, shape index: {}]   ;;  %s780_s3 = inlined_call_operand.vmem [shape: bf16[2,8,286], index: 3, kind: output, shape index: {}]  }
   0x1 LB: > { %s579_s13 = sadd.s32 4294967295, %s662_s12   ;;  %p583_p0 = scmp.ge.s32.totalorder %s662_s12, 1  ;;  %s662_s12 = sphi %s695_s12, %s13_s12  }
   0x2   : > { %p137_p1 = scmp.lt.s32.totalorder %s662_s12, 3 }
   0x4   : > { %p138_p2 = pnand %p583_p0, %p137_p1 }
   0x5   : > { %p161_p3 = scmp.lt.s32.totalorder (!%p138_p2), %s579_s13, 1  ;;  %v664_v1 = vmov (!%p138_p2), 0.0   ;;  %s665_s18 = smov (!%p138_p2), 126   ;;  %vm175_vm0 = vcmask (!%p138_p2), 240640   ;;  %v672_v11 = vmov (!%p138_p2), 0   ;;  %vm673_vm1 = vmmov (!%p138_p2), 0  }
   0x6   : > { %141 = sbr.rel (%p138_p2) target bundleno = 392 (0x188), region = 32  ;;  %616 = vmatprep.subr.bf16.mxu1 (!%p138_p2), %v664_v1  ;;  %s666_s19 = smov (!%p138_p2), 127   ;;  %457 = vmatprep.mubr.bf16.mxu0 (!%p138_p2), %v672_v11  ;;  %v333_v12 = vld [vmem:[%s779_s2] sm:$0xff] (!%p138_p2)  ;;  %vm187_vm2 = vcmask (!%p138_p2), 1043456   ;;  %vm206_vm3 = vcmask (!%p138_p2), 1031168   ;;  %vm189_vm4 = vcmask (!%p138_p2), 1039360  }
   0x7   : > { %s667_s20 = smov (!%p138_p2), 110   ;;  %s668_s21 = smov (!%p138_p2), 109   ;;  %650 = vset.pattern.permute.xlu0 (!%p138_p2), %v672_v11  ;;  %626 = vmatprep.mubr.msk.bf16.mxu1 (!%p138_p2), %vm673_vm1, %v664_v1  ;;  %vm223_vm5 = vcmask (!%p138_p2), 900096   ;;  %vm240_vm6 = vcmask (!%p138_p2), 891904   ;;  %vm257_vm7 = vcmask (!%p138_p2), 883712   ;;  %vm274_vm8 = vcmask (!%p138_p2), 752640  }
   0x8   : > { %s669_s22 = smov (!%p138_p2), 108   ;;  %s670_s23 = smov (!%p138_p2), 92   ;;  %vm291_vm9 = vcmask (!%p138_p2), 744448   ;;  %vm308_vm10 = vcmask (!%p138_p2), 736256   ;;  %vm411_vm11 = vcmask (!%p138_p2), 588800  }
   0x9   : > { %s671_s24 = smov (!%p138_p2), 91   ;;  %s674_s25 = smov (!%p138_p2), 90  }
   0xd   : > { %s782_s13 = smov (!%p161_p3, %s579_s13), 1 }
   0xe   : > { %s630_s14 = smul.u32 12, %s782_s13 }
  0x10   : > { %s711_s17 = scalar_lea.vmem %s777_s0, %s630_s14  ;;  %s170_s5 = scalar_lea.vmem %s780_s3, %s630_s14 }
  0x11   : > { %v714_v0 = vld [vmem:[%s711_s17] sm:$0xff]  ;;  %v196_v2 = vld [vmem:[%s711_s17 + $0x8] sm:$0xf] }
  0x12   : > { %199 = vrot.lane.b32.xlu1 %v714_v0, %s665_s18  ;;  %181 = vrot.lane.b32.xlu0 %v714_v0, %s666_s19  ;;  %v178_v3 = vld [vmem:[%s711_s17 + $0x8] sm:$0xf] }
  0x13   : > { %v173_v4 = vld [vmem:[%s711_s17 + $0x8] sm:$0xf] }
  0x14   : > { %176 = vst.msk [vmem:[#allocation2 + $0x8] sm:$0xf] %vm175_vm0, %v173_v4  ;;  %v213_v5 = vld [vmem:[%s711_s17 + $0x8] sm:$0xf] }
  0x15   : > { %v230_v6 = vld [vmem:[%s711_s17 + $0x8] sm:$0xf] }
  0x16   : > { %201 = vrot.lane.b32.xlu1 %v196_v2, %s665_s18  ;;  %183 = vrot.lane.b32.xlu0 %v178_v3, %s666_s19  ;;  %v247_v7 = vld [vmem:[%s711_s17 + $0x8] sm:$0xf] }
  0x17   : > { %v264_v8 = vld [vmem:[%s711_s17 + $0x8] sm:$0xf] }
  0x18   : > { %v281_v9 = vld [vmem:[%s711_s17 + $0x8] sm:$0xf] }
  0x19   : > { %v298_v10 = vld [vmem:[%s711_s17 + $0x8] sm:$0xf] }
  0x1a   : > { %218 = vrot.lane.b32.xlu1 %v213_v5, %s667_s20  ;;  %216 = vrot.lane.b32.xlu0 %v714_v0, %s667_s20 }
  0x1e   : > { %235 = vrot.lane.b32.xlu1 %v230_v6, %s668_s21  ;;  %233 = vrot.lane.b32.xlu0 %v714_v0, %s668_s21 }
  0x22   : > { %252 = vrot.lane.b32.xlu1 %v247_v7, %s669_s22  ;;  %250 = vrot.lane.b32.xlu0 %v714_v0, %s669_s22 }
  0x26   : > { %269 = vrot.lane.b32.xlu1 %v264_v8, %s670_s23  ;;  %267 = vrot.lane.b32.xlu0 %v714_v0, %s670_s23 }
  0x2a   : > { %286 = vrot.lane.b32.xlu1 %v281_v9, %s671_s24  ;;  %284 = vrot.lane.b32.xlu0 %v714_v0, %s671_s24 }
  0x2e   : > { %303 = vrot.lane.b32.xlu1 %v298_v10, %s674_s25  ;;  %301 = vrot.lane.b32.xlu0 %v714_v0, %s674_s25 }
  0x32   : > { %336 = vperm.xlu0 %650, %v333_v12  }
  0x84   : > { %v200_v13 = vpop.permute.xlu1 %199  ;;  %v182_v14 = vpop.permute.xlu0 %181 }
  0x85   : > { %v203_v17 = vrot.slane %v200_v13, 4  ;;  %v185_v18 = vrot.slane %v182_v14, 4 }
  0x88   : > { %v202_v15 = vpop.permute.xlu1 %201  ;;  %v184_v16 = vpop.permute.xlu0 %183 }
  0x89   : > { %v204_v19 = vrot.slane %v202_v15, 4  ;;  %211 = vst.msk [vmem:[#allocation2 + $0x20] sm:$0xf] %vm175_vm0, %v202_v15  ;;  %v186_v20 = vrot.slane %v184_v16, 4  ;;  %194 = vst.msk [vmem:[#allocation2 + $0x14] sm:$0xf] %vm175_vm0, %v184_v16 }
  0x8b   : > { %v205_v21 = vsel %vm187_vm2, %v203_v17, %v204_v19  ;;  %v188_v22 = vsel %vm187_vm2, %v185_v18, %v186_v20 }
  0x8c   : > { %v207_v23 = vsel %vm206_vm3, %v200_v13, %v205_v21  ;;  %v190_v24 = vsel %vm189_vm4, %v182_v14, %v188_v22  ;;  %v219_v25 = vpop.permute.xlu1 %218  ;;  %v217_v26 = vpop.permute.xlu0 %216  ;;  %v314_v13 = vld [vmem:[%s778_s1] sm:$0xf] }
  0x8d   : > { %v221_v27 = vrot.slane %v219_v25, 4  ;;  %228 = vst.msk [vmem:[#allocation2 + $0x2c] sm:$0xf] %vm175_vm0, %v219_v25  ;;  %v220_v28 = vrot.slane %v217_v26, 4  ;;  %v587_v29 = vcombine.high %v714_v0, %v190_v24  ;;  %v586_v30 = vcombine.low %v714_v0, %v190_v24 }
  0x8f   : > { %v222_v31 = vsel %vm187_vm2, %v220_v28, %v221_v27  ;;  %425 = vmatprep.subr.bf16.mxu0 %v587_v29 }
  0x90   : > { %v224_v32 = vsel %vm223_vm5, %v217_v26, %v222_v31  ;;  %v236_v33 = vpop.permute.xlu1 %235  ;;  %v234_v34 = vpop.permute.xlu0 %233  ;;  %v651_v35 = vld [vmem:[#allocation2 + $0x8] ss:$12 sps:$4 sm:$0xff]   ;;  %426 = vmatpush1.bf16.msra.mxu0 %v586_v30 }
  0x91   : > { %v238_v36 = vrot.slane %v236_v33, 4  ;;  %245 = vst.msk [vmem:[#allocation2 + $0x38] sm:$0xf] %vm175_vm0, %v236_v33  ;;  %v237_v37 = vrot.slane %v234_v34, 4  ;;  %v590_v38 = vcombine.high %v207_v23, %v224_v32  ;;  %v589_v39 = vcombine.low %v207_v23, %v224_v32  ;;  %617 = vmatpush3.bf16.msra.mxu1 %v651_v35 }
  0x92   : > { %618 = vmatprep.subr.bf16.mxu1 %v664_v1 }
  0x93   : > { %v239_v40 = vsel %vm187_vm2, %v237_v37, %v238_v36  ;;  %427 = vmatprep.subr.bf16.mxu0 %v590_v38 }
  0x94   : > { %v241_v41 = vsel %vm240_vm6, %v234_v34, %v239_v40  ;;  %v253_v42 = vpop.permute.xlu1 %252  ;;  %v251_v43 = vpop.permute.xlu0 %250  ;;  %v652_v44 = vld [vmem:[#allocation2 + $0x20] ss:$12 sps:$4 sm:$0xff]   ;;  %428 = vmatpush1.bf16.msra.mxu0 %v589_v39 }
  0x95   : > { %v255_v45 = vrot.slane %v253_v42, 4  ;;  %262 = vst.msk [vmem:[#allocation2 + $0x44] sm:$0xf] %vm175_vm0, %v253_v42  ;;  %v254_v46 = vrot.slane %v251_v43, 4  ;;  %619 = vmatpush3.bf16.msra.mxu1 %v652_v44 }
  0x96   : > { %620 = vmatprep.subr.bf16.mxu1 %v664_v1 }
  0x97   : > { %v256_v47 = vsel %vm187_vm2, %v254_v46, %v255_v45 }
  0x98   : > { %v258_v48 = vsel %vm257_vm7, %v251_v43, %v256_v47  ;;  %v270_v49 = vpop.permute.xlu1 %269  ;;  %v268_v50 = vpop.permute.xlu0 %267 }
  0x99   : > { %v272_v51 = vrot.slane %v270_v49, 4  ;;  %279 = vst.msk [vmem:[#allocation2 + $0x50] sm:$0xf] %vm175_vm0, %v270_v49  ;;  %v271_v52 = vrot.slane %v268_v50, 4  ;;  %v593_v53 = vcombine.high %v241_v41, %v258_v48  ;;  %v592_v54 = vcombine.low %v241_v41, %v258_v48 }
  0x9b   : > { %v273_v55 = vsel %vm187_vm2, %v271_v52, %v272_v51  ;;  %429 = vmatprep.subr.bf16.mxu0 %v593_v53 }
  0x9c   : > { %v275_v56 = vsel %vm274_vm8, %v268_v50, %v273_v55  ;;  %v287_v57 = vpop.permute.xlu1 %286  ;;  %v285_v58 = vpop.permute.xlu0 %284  ;;  %v653_v59 = vld [vmem:[#allocation2 + $0x38] ss:$12 sps:$4 sm:$0xff]   ;;  %430 = vmatpush1.bf16.msra.mxu0 %v592_v54 }
  0x9d   : > { %v289_v60 = vrot.slane %v287_v57, 4  ;;  %296 = vst.msk [vmem:[#allocation2 + $0x5c] sm:$0xf] %vm175_vm0, %v287_v57  ;;  %v288_v61 = vrot.slane %v285_v58, 4  ;;  %621 = vmatpush3.bf16.msra.mxu1 %v653_v59 }
  0x9e   : > { %622 = vmatprep.subr.bf16.mxu1 %v664_v1 }
  0x9f   : > { %v290_v62 = vsel %vm187_vm2, %v288_v61, %v289_v60 }
  0xa0   : > { %v292_v63 = vsel %vm291_vm9, %v285_v58, %v290_v62  ;;  %v304_v0 = vpop.permute.xlu1 %303  ;;  %v302_v2 = vpop.permute.xlu0 %301 }
  0xa1   : > { %v306_v3 = vrot.slane %v304_v0, 4  ;;  %313 = vst.msk [vmem:[#allocation2 + $0x68] sm:$0xf] %vm175_vm0, %v304_v0  ;;  %v305_v4 = vrot.slane %v302_v2, 4  ;;  %v596_v5 = vcombine.high %v275_v56, %v292_v63  ;;  %v595_v6 = vcombine.low %v275_v56, %v292_v63 }
  0xa3   : > { %v307_v7 = vsel %vm187_vm2, %v305_v4, %v306_v3  ;;  %431 = vmatprep.subr.bf16.mxu0 %v596_v5 }
  0xa4   : > { %v309_v8 = vsel %vm308_vm10, %v302_v2, %v307_v7  ;;  %v654_v9 = vld [vmem:[#allocation2 + $0x50] ss:$12 sps:$4 sm:$0xff]   ;;  %432 = vmatpush1.bf16.msra.mxu0 %v595_v6 }
  0xa5   : > { %v599_v10 = vcombine.high %v309_v8, %v309_v8  ;;  %v598_v11 = vcombine.low %v309_v8, %v309_v8  ;;  %623 = vmatpush3.bf16.msra.mxu1 %v654_v9 }
  0xa6   : > { %624 = vmatprep.subr.bf16.mxu1 %v664_v1 }
  0xa7   : > { %601 = vmatprep.subr.msk.bf16.mxu0 %vm187_vm2, %v599_v10  ;;  %v417_v12 = vsel %vm187_vm2, %v598_v11, 0 }
  0xa8   : > { %v655_v14 = vld [vmem:[#allocation2 + $0x68] ss:$0 sps:$4 sm:$0xff]   ;;  %434 = vmatpush1.bf16.msra.mxu0 %v417_v12 }
  0xa9   : > { %v423_v15 = vsel %vm187_vm2, %v655_v14, 0 }
  0xaa   : > { %625 = vmatpush3.bf16.msra.mxu1 %v423_v15 }
  0xab   : > { %602 = vmatmul.mubr.msk.bf16.vlgmr.msra.gmra.mrb[0].mxu0 %vm411_vm11, %v314_v13 }
  0xad   : > { %627 = vmatmul.mubr.msk.bf16.vlgmr.msra.gmra.mrb[0].mxu1 %vm411_vm11, %v314_v13 }
  0xb1   : > { %v337_v16 = vpop.permute.xlu0 %336 }
 0x17e   : > { %v459_v17 = vpop.f32.mrb[0].mxu0 }
 0x17f   : > { %v460_v1 = vadd.f32 %v459_v17, %v337_v16  ;;  %v461_v18 = vpop.f32.mrb[1].mxu0 }
 0x180   : > { %v462_v19 = vadd.f32 %v461_v18, %v337_v16  ;;  %v463_v20 = vpop.f32.mrb[2].mxu0  ;;  %v500_v21 = vpop.f32.mrb[0].mxu1 }
 0x181   : > { %v506_v22 = vmax.f32 %v460_v1, 0.0  ;;  %v464_v23 = vpop.f32.mrb[3].mxu0  ;;  %v628_v24 = vpop.f32.mrb[1].mxu1  ;;  %v501_v25 = vadd.f32 %v500_v21, %v337_v16 }
 0x182   : > { %v507_v26 = vmax.f32 %v462_v19, 0.0  ;;  %v503_v27 = vpop.f32.mrb[2].mxu1 }
 0x183   : > { %v508_v28 = vmax.f32 %v501_v25, 0.0  ;;  %v629_v30 = vpop.f32.mrb[3].mxu1 }
 0x184   : > { %v608_v29 = vpack.c.bf16 %v507_v26, %v506_v22 }
 0x185   : > { %v609_v31 = vpack.c.bf16 %v508_v28, %v508_v28 }
 0x186   : > { %522 = vst [vmem:[%s170_s5] sm:$0xff] %v608_v29 }
 0x187   : > { %523 = vst.msk [vmem:[%s170_s5 + $0x8] sm:$0xf] %vm175_vm0, %v609_v31 }
 0x188 PF: > { %s13_s12 = sadd.s32 1, %s662_s12  }
 0x189   : > { %p10_p4 = scmp.ge.s32.totalorder %s13_s12, 4  }
 0x18b   :  { %12 = sbr.rel (!%p10_p4) target bundleno = 1 (0x1), region = 62 }

// kernel: _lambda_.9
= control target key start
LH: loop header
LB: loop body
LE: loop exit
PB: predicated region body
PF: predicated region fallthrough
CT: control target
= control target key end

     0   :  { %s527_s12 = smov 0   ;;  %s529_s13 = smov 0   ;;  %s573_s0 = inlined_call_operand.vmem [shape: bf16[2,72,64], index: 0, kind: input, shape index: {}]   ;;  %s574_s1 = inlined_call_operand.vmem [shape: bf16[16,72], index: 1, kind: input, shape index: {}]   ;;  %s575_s2 = inlined_call_operand.vmem [shape: f32[16,1], index: 2, kind: input, shape index: {}]   ;;  %s576_s3 = inlined_call_operand.vmem [shape: bf16[2,16,64], index: 3, kind: output, shape index: {}]  }
   0x1   :  { %s531_s14 = smov 0  }
   0x2 LB: > { %s25_s15 = sadd.s32 1, %s498_s13  ;;  %p407_p0 = scmp.ge.s32.totalorder %s502_s14, 1  ;;  %s502_s14 = sphi %s531_s14, %s13_s14   ;;  %s498_s13 = sphi %s529_s13, %s578_s13   ;;  %s494_s12 = sphi %s527_s12, %s577_s12  }
   0x3   : > { %p27_p1 = scmp.ge.s32.totalorder %s25_s15, 2  ;;  %p156_p2 = scmp.lt.s32.totalorder %s502_s14, 3 }
   0x5   : > { %s580_s15 = smov (%p27_p1, %s25_s15), 0  ;;  %p157_p3 = pnand %p407_p0, %p156_p2 }
   0x6   : > { %p186_p4 = scmp.lt.s32.totalorder (!%p157_p3), %s494_s12, 1  ;;  %v504_v0 = vmov (!%p157_p3), 0.0   ;;  %vm505_vm0 = vmmov (!%p157_p3), 0   ;;  %v214_v1 = vld [vmem:[%s575_s2] sm:$0xff] (!%p157_p3)  ;;  %v506_v2 = vmov (!%p157_p3), 0   ;;  %v215_v3 = vld [vmem:[%s575_s2 + $0x8] sm:$0xff] (!%p157_p3) }
   0x7   : > { %160 = sbr.rel (%p157_p3) target bundleno = 259 (0x103), region = 32  ;;  %431 = vmatprep.subr.bf16.mxu0 (!%p157_p3), %v504_v0  ;;  %441 = vmatprep.mubr.msk.bf16.mxu0 (!%p157_p3), %vm505_vm0, %v504_v0  ;;  %vm262_vm1 = vcmask (!%p157_p3), 1043456   ;;  %v479_v10 = vld [vmem:[%s574_s1] sm:$0xff] (!%p157_p3)   ;;  %vm258_vm2 = vcmask (!%p157_p3), 588800   ;;  %vm317_vm3 = vcmask (!%p157_p3), 519168  }
   0x8   : > { %473 = vset.pattern.permute.xlu0 (!%p157_p3), %v506_v2 }
   0x9   : > { %218 = vperm.xlu0 (!%p157_p3), %473, %v214_v1  }
   0xd   : > { %223 = vperm.xlu0 (!%p157_p3), %473, %v215_v3  }
   0xe   : > { %s582_s12 = smov (!%p186_p4, %s494_s12), 1 }
   0xf   : > { %s445_s18 = smul.u32 36, %s582_s12  ;;  %s422_s26 = sshll.u32 %s582_s12, 3 }
  0x10   : > { %s201_s29 = scalar_lea.vmem %s576_s3, %s422_s26 }
  0x11   : > { %s193_s23 = scalar_lea.vmem %s573_s0, %s445_s18 }
  0x12   : > { %v474_v4 = vld [vmem:[%s193_s23] sm:$0xff]   ;;  %v475_v5 = vld [vmem:[%s193_s23 + $0x8] sm:$0xff]   ;;  %v476_v6 = vld [vmem:[%s193_s23 + $0x10] sm:$0xff]  }
  0x13   : > { %432 = vmatpush3.bf16.msra.mxu0 %v474_v4  ;;  %v477_v7 = vld [vmem:[%s193_s23 + $0x18] sm:$0xff]   ;;  %v478_v8 = vld [vmem:[%s193_s23 + $0x20] ss:$0 sps:$4 sm:$0xff]  }
  0x14   : > { %433 = vmatprep.subr.bf16.mxu0 %v504_v0  ;;  %v264_v9 = vsel %vm262_vm1, %v478_v8, 0 }
  0x17   : > { %434 = vmatpush3.bf16.msra.mxu0 %v475_v5 }
  0x18   : > { %435 = vmatprep.subr.bf16.mxu0 %v504_v0 }
  0x1b   : > { %436 = vmatpush3.bf16.msra.mxu0 %v476_v6 }
  0x1c   : > { %437 = vmatprep.subr.bf16.mxu0 %v504_v0 }
  0x1f   : > { %438 = vmatpush3.bf16.msra.mxu0 %v477_v7 }
  0x20   : > { %439 = vmatprep.subr.bf16.mxu0 %v504_v0 }
  0x23   : > { %440 = vmatpush3.bf16.msra.mxu0 %v264_v9 }
  0x26   : > { %442 = vmatmul.mubr.msk.bf16.vlgmr.msra.gmra.mrb[0].mxu0 %vm258_vm2, %v479_v10 }
  0x88   : > { %v219_v11 = vpop.permute.xlu0 %218 }
  0x8c   : > { %v224_v15 = vpop.permute.xlu0 %223 }
  0xf9   : > { %v300_v12 = vpop.f32.mrb[0].mxu0 }
  0xfa   : > { %v301_v13 = vadd.f32 %v300_v12, %v219_v11  ;;  %v443_v14 = vpop.f32.mrb[1].mxu0 }
  0xfb   : > { %v303_v16 = vpop.f32.mrb[2].mxu0 }
  0xfc   : > { %v307_v17 = vmax.f32 %v301_v13, 0.0  ;;  %v304_v18 = vadd.f32 %v303_v16, %v224_v15  ;;  %v444_v19 = vpop.f32.mrb[3].mxu0 }
  0xfe   : > { %v423_v20 = vpack.c.bf16 %v307_v17, %v307_v17  ;;  %v308_v21 = vmax.f32 %v304_v18, 0.0 }
 0x100   : > { %318 = vst.msk [vmem:[%s201_s29] sm:$0xf] %vm317_vm3, %v423_v20  ;;  %v424_v22 = vpack.c.bf16 %v308_v21, %v308_v21 }
 0x102   : > { %319 = vst.msk [vmem:[%s201_s29 + $0x4] sm:$0xf] %vm317_vm3, %v424_v22 }
 0x103 PF: > { %s13_s14 = sadd.s32 1, %s502_s14   ;;  %s577_s12 = smov %s498_s13 }
 0x104   : > { %p10_p5 = scmp.ge.s32.totalorder %s13_s14, 4   ;;  %s578_s13 = smov %s580_s15 }
 0x106   :  { %12 = sbr.rel (!%p10_p5) target bundleno = 2 (0x2), region = 62 }

// kernel: _lambda_.10
= control target key start
LH: loop header
LB: loop body
LE: loop exit
PB: predicated region body
PF: predicated region fallthrough
CT: control target
= control target key end

     0   :  { %s512_s12 = smov 0   ;;  %s568_s0 = inlined_call_operand.vmem [shape: bf16[2,16,100], index: 0, kind: input, shape index: {}]   ;;  %s569_s1 = inlined_call_operand.vmem [shape: bf16[16,144], index: 1, kind: input, shape index: {}]   ;;  %s570_s2 = inlined_call_operand.vmem [shape: f32[16,1], index: 2, kind: input, shape index: {}]   ;;  %s571_s3 = inlined_call_operand.vmem [shape: bf16[2,16,78], index: 3, kind: output, shape index: {}]  }
   0x1 LB: > { %s415_s13 = sadd.s32 4294967295, %s481_s12   ;;  %p419_p0 = scmp.ge.s32.totalorder %s481_s12, 1  ;;  %s481_s12 = sphi %s512_s12, %s13_s12  }
   0x2   : > { %p137_p1 = scmp.lt.s32.totalorder %s481_s12, 3 }
   0x4   : > { %p138_p2 = pnand %p419_p0, %p137_p1 }
   0x5   : > { %p161_p3 = scmp.lt.s32.totalorder (!%p138_p2), %s415_s13, 1  ;;  %v483_v0 = vmov (!%p138_p2), 0   ;;  %s484_s18 = smov (!%p138_p2), 127   ;;  %vm180_vm0 = vcmask (!%p138_p2), 637952   ;;  %v474_v11 = vld [vmem:[%s569_s1 + $0x4] ss:$8 sps:$4 sm:$0xff] (!%p138_p2)  }
   0x6   : > { %141 = sbr.rel (%p138_p2) target bundleno = 392 (0x188), region = 32  ;;  %306 = vmatprep.subr.bf16.mxu0 (!%p138_p2), %v483_v0  ;;  %461 = vset.pattern.permute.xlu0 (!%p138_p2), %v483_v0  ;;  %s485_s19 = smov (!%p138_p2), 118   ;;  %vm302_vm1 = vcmask (!%p138_p2), 130048   ;;  %v281_v12 = vld [vmem:[%s570_s2] sm:$0xff] (!%p138_p2)  ;;  %v282_v13 = vld [vmem:[%s570_s2 + $0x8] sm:$0xff] (!%p138_p2)  ;;  %vm357_vm2 = vcmask (!%p138_p2), 633856  }
   0x7   : > { %462 = vset.pattern.permute.xlu1 (!%p138_p2), %v483_v0  ;;  %s486_s20 = smov (!%p138_p2), 126   ;;  %s487_s21 = smov (!%p138_p2), 117   ;;  %435 = vmatprep.mubr.msk.bf16.mxu0 (!%p138_p2), %vm302_vm1, %v474_v11  ;;  %v472_v30 = vld [vmem:[%s569_s1] ss:$8 sps:$4 sm:$0xff] (!%p138_p2)  }
   0x8   : > { %s488_s22 = smov (!%p138_p2), 116   ;;  %s489_s23 = smov (!%p138_p2), 108  }
   0x9   : > { %s490_s24 = smov (!%p138_p2), 107   ;;  %s491_s25 = smov (!%p138_p2), 106  }
   0xd   : > { %s573_s13 = smov (!%p161_p3, %s415_s13), 1 }
   0xe   : > { %s440_s14 = sshll.u32 %s573_s13, 3 }
   0xf   : > { %s165_s17 = scalar_lea.vmem %s568_s0, %s440_s14  ;;  %s170_s9 = scalar_lea.vmem %s571_s3, %s440_s14 }
  0x10   : > { %v463_v1 = vld [vmem:[%s165_s17] sm:$0xff]  }
  0x11   : > { %v464_v2 = vld [vmem:[%s165_s17] sm:$0xff]   ;;  %189 = vrot.lane.b32.xlu0 %v463_v1, %s484_s18 }
  0x12   : > { %v465_v3 = vld [vmem:[%s165_s17] sm:$0xff]  }
  0x13   : > { %211 = vrot.lane.b32.xlu1 %v465_v3, %s485_s19  ;;  %v466_v4 = vld [vmem:[%s165_s17] sm:$0xff]  }
  0x14   : > { %v467_v5 = vld [vmem:[%s165_s17] sm:$0xff]  }
  0x15   : > { %200 = vrot.lane.b32.xlu0 %v464_v2, %s486_s20  ;;  %v468_v6 = vld [vmem:[%s165_s17] sm:$0xff]  }
  0x16   : > { %v471_v7 = vld [vmem:[%s165_s17] sm:$0xff]  }
  0x17   : > { %222 = vrot.lane.b32.xlu1 %v466_v4, %s487_s21  ;;  %v469_v8 = vld [vmem:[%s165_s17] sm:$0xff]   ;;  %181 = vst.msk [vmem:[#allocation2] sm:$0xff] %vm180_vm0, %v471_v7 }
  0x18   : > { %v470_v9 = vld [vmem:[%s165_s17] sm:$0xff]  }
  0x19   : > { %233 = vrot.lane.b32.xlu0 %v467_v5, %s488_s22 }
  0x1b   : > { %244 = vrot.lane.b32.xlu1 %v468_v6, %s489_s23 }
  0x1d   : > { %255 = vrot.lane.b32.xlu0 %v469_v8, %s490_s24 }
  0x1e   : > { %v272_v10 = vld [vmem:[#allocation2] sm:$0xff] }
  0x1f   : > { %266 = vrot.lane.b32.xlu1 %v470_v9, %s491_s25  ;;  %307 = vmatpush1.bf16.msra.mxu0 %v272_v10 }
  0x20   : > { %308 = vmatprep.subr.bf16.mxu0 %v483_v0 }
  0x21   : > { %285 = vperm.xlu0 %461, %v281_v12  }
  0x23   : > { %290 = vperm.xlu1 %462, %v282_v13  }
  0x83   : > { %v190_v14 = vpop.permute.xlu0 %189 }
  0x84   : > { %192 = vst.msk [vmem:[#allocation2 + $0x8] sm:$0xff] %vm180_vm0, %v190_v14 }
  0x85   : > { %v212_v15 = vpop.permute.xlu1 %211 }
  0x86   : > { %214 = vst.msk [vmem:[#allocation2 + $0x18] sm:$0xff] %vm180_vm0, %v212_v15 }
  0x87   : > { %v201_v16 = vpop.permute.xlu0 %200 }
  0x88   : > { %203 = vst.msk [vmem:[#allocation2 + $0x10] sm:$0xff] %vm180_vm0, %v201_v16 }
  0x89   : > { %v223_v17 = vpop.permute.xlu1 %222 }
  0x8a   : > { %225 = vst.msk [vmem:[#allocation2 + $0x20] sm:$0xff] %vm180_vm0, %v223_v17 }
  0x8b   : > { %v273_v18 = vld [vmem:[#allocation2 + $0x8] sm:$0xff]  ;;  %v234_v19 = vpop.permute.xlu0 %233 }
  0x8c   : > { %309 = vmatpush1.bf16.msra.mxu0 %v273_v18  ;;  %236 = vst.msk [vmem:[#allocation2 + $0x28] sm:$0xff] %vm180_vm0, %v234_v19 }
  0x8d   : > { %310 = vmatprep.subr.bf16.mxu0 %v483_v0  ;;  %v245_v20 = vpop.permute.xlu1 %244  ;;  %v275_v23 = vld [vmem:[#allocation2 + $0x18] sm:$0xff] }
  0x8e   : > { %247 = vst.msk [vmem:[#allocation2 + $0x30] sm:$0xff] %vm180_vm0, %v245_v20 }
  0x8f   : > { %v274_v21 = vld [vmem:[#allocation2 + $0x10] sm:$0xff]  ;;  %v256_v22 = vpop.permute.xlu0 %255 }
  0x90   : > { %311 = vmatpush1.bf16.msra.mxu0 %v274_v21  ;;  %258 = vst.msk [vmem:[#allocation2 + $0x38] sm:$0xff] %vm180_vm0, %v256_v22 }
  0x91   : > { %312 = vmatprep.subr.bf16.mxu0 %v483_v0  ;;  %v267_v24 = vpop.permute.xlu1 %266  ;;  %v276_v25 = vld [vmem:[#allocation2 + $0x20] sm:$0xff] }
  0x92   : > { %269 = vst.msk [vmem:[#allocation2 + $0x40] sm:$0xff] %vm180_vm0, %v267_v24 }
  0x93   : > { %v277_v26 = vld [vmem:[#allocation2 + $0x28] sm:$0xff] }
  0x94   : > { %313 = vmatpush1.bf16.msra.mxu0 %v275_v23 }
  0x95   : > { %314 = vmatprep.subr.bf16.mxu0 %v483_v0  ;;  %v278_v27 = vld [vmem:[#allocation2 + $0x30] sm:$0xff] }
  0x97   : > { %v279_v28 = vld [vmem:[#allocation2 + $0x38] sm:$0xff] }
  0x98   : > { %315 = vmatpush1.bf16.msra.mxu0 %v276_v25 }
  0x99   : > { %316 = vmatprep.subr.bf16.mxu0 %v483_v0  ;;  %v280_v29 = vld [vmem:[#allocation2 + $0x40] sm:$0xff] }
  0x9c   : > { %317 = vmatpush1.bf16.msra.mxu0 %v277_v26 }
  0x9d   : > { %318 = vmatprep.subr.bf16.mxu0 %v483_v0 }
  0xa0   : > { %319 = vmatpush1.bf16.msra.mxu0 %v278_v27  ;;  %v286_v31 = vpop.permute.xlu0 %285 }
  0xa1   : > { %320 = vmatprep.subr.bf16.mxu0 %v483_v0 }
  0xa2   : > { %v291_v33 = vpop.permute.xlu1 %290 }
  0xa4   : > { %321 = vmatpush1.bf16.msra.mxu0 %v279_v28 }
  0xa5   : > { %322 = vmatprep.subr.bf16.mxu0 %v483_v0 }
  0xa8   : > { %323 = vmatpush1.bf16.msra.mxu0 %v280_v29 }
  0xab   : > { %339 = vmatmul.mubr.bf16.vlgmr.msra.gmra.mrb[0].mxu0 %v472_v30 }
 0x17e   : > { %v340_v32 = vpop.f32.mrb[0].mxu0 }
 0x17f   : > { %v341_v34 = vadd.f32 %v340_v32, %v286_v31  ;;  %v342_v35 = vpop.f32.mrb[1].mxu0 }
 0x180   : > { %v343_v36 = vpop.f32.mrb[2].mxu0 }
 0x181   : > { %v347_v37 = vmax.f32 %v341_v34, 0.0  ;;  %v344_v38 = vadd.f32 %v343_v36, %v291_v33  ;;  %v345_v39 = vpop.f32.mrb[3].mxu0 }
 0x183   : > { %v442_v40 = vpack.c.bf16 %v347_v37, %v347_v37  ;;  %v348_v41 = vmax.f32 %v344_v38, 0.0 }
 0x185   : > { %358 = vst.msk [vmem:[%s170_s9] sm:$0xf] %vm357_vm2, %v442_v40  ;;  %v443_v42 = vpack.c.bf16 %v348_v41, %v348_v41 }
 0x187   : > { %359 = vst.msk [vmem:[%s170_s9 + $0x4] sm:$0xf] %vm357_vm2, %v443_v42 }
 0x188 PF: > { %s13_s12 = sadd.s32 1, %s481_s12  }
 0x189   : > { %p10_p4 = scmp.ge.s32.totalorder %s13_s12, 4  }
 0x18b   :  { %12 = sbr.rel (!%p10_p4) target bundleno = 1 (0x1), region = 62 }

// kernel: _lambda_.11
= control target key start
LH: loop header
LB: loop body
LE: loop exit
PB: predicated region body
PF: predicated region fallthrough
CT: control target
= control target key end

     0   :  { %s523_s12 = smov 0   ;;  %s525_s13 = smov 0   ;;  %s580_s0 = inlined_call_operand.vmem [shape: bf16[2,16,64], index: 0, kind: input, shape index: {}]   ;;  %s581_s1 = inlined_call_operand.vmem [shape: bf16[32,16], index: 1, kind: input, shape index: {}]   ;;  %s582_s2 = inlined_call_operand.vmem [shape: f32[32,1], index: 2, kind: input, shape index: {}]   ;;  %s583_s3 = inlined_call_operand.vmem [shape: bf16[2,32,64], index: 3, kind: output, shape index: {}]  }
   0x1   :  { %s527_s14 = smov 0  }
   0x2 LB: > { %s25_s15 = sadd.s32 1, %s496_s13  ;;  %p417_p0 = scmp.ge.s32.totalorder %s500_s14, 1  ;;  %s500_s14 = sphi %s527_s14, %s13_s14   ;;  %s496_s13 = sphi %s525_s13, %s585_s13   ;;  %s492_s12 = sphi %s523_s12, %s584_s12  }
   0x3   : > { %p27_p1 = scmp.ge.s32.totalorder %s25_s15, 2  ;;  %p156_p2 = scmp.lt.s32.totalorder %s500_s14, 3 }
   0x5   : > { %s587_s15 = smov (%p27_p1, %s25_s15), 0  ;;  %p157_p3 = pnand %p417_p0, %p156_p2 }
   0x6   : > { %p186_p4 = scmp.lt.s32.totalorder (!%p157_p3), %s492_s12, 1  ;;  %v476_v0 = vld [vmem:[%s581_s1] sm:$0xff] (!%p157_p3)   ;;  %vm249_vm0 = vcmask (!%p157_p3), 130048   ;;  %v211_v1 = vld [vmem:[%s582_s2 + $0x10] sm:$0xff] (!%p157_p3)  ;;  %v502_v3 = vmov (!%p157_p3), 0   ;;  %v212_v4 = vld [vmem:[%s582_s2 + $0x18] sm:$0xff] (!%p157_p3) }
   0x7   : > { %160 = sbr.rel (%p157_p3) target bundleno = 244 (0xf4), region = 32  ;;  %444 = vmatprep.mubr.msk.bf16.mxu0 (!%p157_p3), %vm249_vm0, %v476_v0  ;;  %v209_v2 = vld [vmem:[%s582_s2] sm:$0xff] (!%p157_p3)  ;;  %474 = vset.pattern.permute.xlu1 (!%p157_p3), %v502_v3  ;;  %v210_v5 = vld [vmem:[%s582_s2 + $0x8] sm:$0xff] (!%p157_p3)  ;;  %vm325_vm1 = vcmask (!%p157_p3), 519168  }
   0x8   : > { %473 = vset.pattern.permute.xlu0 (!%p157_p3), %v502_v3  ;;  %225 = vperm.xlu1 (!%p157_p3), %474, %v211_v1   ;;  %v477_v7 = vld [vmem:[%s581_s1 + $0x8] sm:$0xff] (!%p157_p3)  }
   0x9   : > { %215 = vperm.xlu0 (!%p157_p3), %473, %v209_v2  }
   0xc   : > { %230 = vperm.xlu1 (!%p157_p3), %474, %v212_v4  }
   0xd   : > { %220 = vperm.xlu0 (!%p157_p3), %473, %v210_v5  }
   0xe   : > { %s589_s12 = smov (!%p186_p4, %s492_s12), 1 }
   0xf   : > { %s433_s22 = sshll.u32 %s589_s12, 3  ;;  %s434_s5 = sshll.u32 %s589_s12, 4 }
  0x10   : > { %s193_s25 = scalar_lea.vmem %s580_s0, %s433_s22  ;;  %s201_s8 = scalar_lea.vmem %s583_s3, %s434_s5 }
  0x11   : > { %v475_v6 = vld [vmem:[%s193_s25] sm:$0xff]  }
  0x12   : > { %442 = vmatprep.subr.bf16.mxu0 %v475_v6 }
  0x13   : > { %443 = vmatpush3.bf16.msra.mxu0 %v475_v6 }
  0x16   : > { %445 = vmatmul.mubr.msk.bf16.vlgmr.msra.gmra.mrb[0].mxu0 %vm249_vm0, %v477_v7 }
  0x87   : > { %v226_v8 = vpop.permute.xlu1 %225 }
  0x88   : > { %v216_v9 = vpop.permute.xlu0 %215 }
  0x8b   : > { %v231_v13 = vpop.permute.xlu1 %230 }
  0x8c   : > { %v221_v16 = vpop.permute.xlu0 %220 }
  0xe9   : > { %v446_v10 = vpop.f32.mrb[0].mxu0 }
  0xea   : > { %v299_v11 = vadd.f32 %v446_v10, %v226_v8  ;;  %v290_v12 = vpop.f32.mrb[1].mxu0 }
  0xeb   : > { %v291_v14 = vadd.f32 %v290_v12, %v216_v9  ;;  %v447_v15 = vpop.f32.mrb[2].mxu0 }
  0xec   : > { %v307_v17 = vmax.f32 %v299_v11, 0.0  ;;  %v302_v18 = vadd.f32 %v447_v15, %v231_v13  ;;  %v293_v19 = vpop.f32.mrb[3].mxu0 }
  0xed   : > { %v305_v20 = vmax.f32 %v291_v14, 0.0  ;;  %v294_v21 = vadd.f32 %v293_v19, %v221_v16 }
  0xee   : > { %v437_v22 = vpack.c.bf16 %v307_v17, %v307_v17  ;;  %v308_v23 = vmax.f32 %v302_v18, 0.0 }
  0xef   : > { %v435_v24 = vpack.c.bf16 %v305_v20, %v305_v20  ;;  %v306_v25 = vmax.f32 %v294_v21, 0.0 }
  0xf0   : > { %328 = vst.msk [vmem:[%s201_s8 + $0x8] sm:$0xf] %vm325_vm1, %v437_v22  ;;  %v438_v26 = vpack.c.bf16 %v308_v23, %v308_v23 }
  0xf1   : > { %326 = vst.msk [vmem:[%s201_s8] sm:$0xf] %vm325_vm1, %v435_v24  ;;  %v436_v27 = vpack.c.bf16 %v306_v25, %v306_v25 }
  0xf2   : > { %329 = vst.msk [vmem:[%s201_s8 + $0xc] sm:$0xf] %vm325_vm1, %v438_v26 }
  0xf3   : > { %327 = vst.msk [vmem:[%s201_s8 + $0x4] sm:$0xf] %vm325_vm1, %v436_v27 }
  0xf4 PF: > { %s13_s14 = sadd.s32 1, %s500_s14   ;;  %s584_s12 = smov %s496_s13 }
  0xf5   : > { %p10_p5 = scmp.ge.s32.totalorder %s13_s14, 4   ;;  %s585_s13 = smov %s587_s15 }
  0xf7   :  { %12 = sbr.rel (!%p10_p5) target bundleno = 2 (0x2), region = 62 }

</bundles_post_ra>
